<compile_context>
chip_gen: v6e
topology: v6e:2x2x1
jax: 0.10.0
libtpu: 0.0.40
codegen_flags: <defaults>
</compile_context>

<pallas_src>
import functools

import jax
import jax.numpy as jnp
from jax import lax
from jax.experimental import pallas as pl
from jax.experimental.pallas import tpu as pltpu


def attention_kernel(gamma_ref, xf_ref, wall_ref, wo_ref, out_ref,
                     pg_s, hm_s, theta_s, phi_s, g_s):
    # Static shapes recovered from the refs.
    _, HW, C = xf_ref.shape
    H, Wh, ctot = hm_s.shape            # Wh = W // 2
    HW4, c8 = phi_s.shape               # HW4 = HW // 4
    tq = out_ref.shape[1]
    j = pl.program_id(1)

    # ---- once per batch element: fused theta|phi|g 1x1 conv + 2x2 max-pool -
    @pl.when(j == 0)
    def _():
        xb = xf_ref[0].astype(jnp.bfloat16)                        # (HW, C)
        # One wide, lane-dense MXU matmul for all three projections.
        full = jnp.dot(xb, wall_ref[...],
                       preferred_element_type=jnp.float32)         # (HW, ctot)
        # Full-resolution theta, stored once as the bf16 MXU operand reused by
        # every query tile.
        theta_s[...] = full[:, :c8].astype(jnp.bfloat16)
        pg_s[...] = full
        # 2x2 max-pool.  x_flat rows are (h, w) row-major, so horizontal pairs
        # (w, w+1) are adjacent rows -> stride-2 sublane slices; vertical pairs
        # (h, h+1) are stride-2 on the leading axis of the (H, W/2, .) view.
        # (The theta columns get pooled too; that sliver of VPU work once per
        # batch element is cheaper than a second, narrower pooling pass.)
        h_max = jnp.maximum(pg_s[pl.ds(0, HW // 2, 2), :],
                            pg_s[pl.ds(1, HW // 2, 2), :])         # (HW/2, ctot)
        hm_s[...] = h_max.reshape(H, Wh, ctot)
        pooled = jnp.maximum(hm_s[pl.ds(0, H // 2, 2)],
                             hm_s[pl.ds(1, H // 2, 2)])            # (H/2, W/2, .)
        pooled = pooled.reshape(HW4, ctot)
        phi_s[...] = pooled[:, c8:2 * c8].astype(jnp.bfloat16)     # (HW/4, c8)
        g_s[...] = pooled[:, 2 * c8:].astype(jnp.bfloat16)         # (HW/4, c2)

    # ---- per query tile ----------------------------------------------------
    row0 = pl.multiple_of(j * tq, tq)
    theta = theta_s[pl.ds(row0, tq), :]                            # (tq, c8) bf16

    # logits = theta @ phi^T as an NT dot_general (no in-kernel transpose).
    logits = lax.dot_general(theta, phi_s[...],
                             (((1,), (1,)), ((), ())),
                             preferred_element_type=jnp.float32)   # (tq, HW/4)

    # Softmax over pooled pixels (f32, max-subtracted).  The 1/sum scaling is
    # folded into the small (tq, c2) o_mid instead of the (tq, HW/4) beta —
    # numerically equivalent (per-row scalar commutes through the matmul).
    m = jnp.max(logits, axis=-1, keepdims=True)
    e = jnp.exp(logits - m)
    s = jnp.sum(e, axis=-1, keepdims=True)

    o_mid = jnp.dot(e.astype(jnp.bfloat16), g_s[...],
                    preferred_element_type=jnp.float32)            # (tq, c2)
    o_mid = o_mid * pl.reciprocal(s, approx=True)
    o = jnp.dot(o_mid.astype(jnp.bfloat16), wo_ref[...],
                preferred_element_type=jnp.float32)                # (tq, C)

    # Residual add in f32 registers even when x is streamed as bf16.
    xq = xf_ref[0, pl.ds(row0, tq), :].astype(jnp.float32)
    out_ref[0] = gamma_ref[0] * o + xq


def _tpu_generation():
    """Best-effort TPU generation tag: 'v5' / 'v6' / 'v7' / ''."""
    try:
        kind = jax.devices()[0].device_kind.lower()
    except Exception:
        return ""
    if "v7" in kind or "7x" in kind:
        return "v7"
    if "v6" in kind:
        return "v6"
    if "v5" in kind:
        return "v5"
    return ""


def attention_pallas(x, wt, wp, wg, wo, gamma, *, tq=None, x_bf16=None):
    """x: (B, C, H, W) float32 (NCHW, like PyTorch). Returns NCHW float32."""
    B, C, H, W = x.shape
    HW = H * W
    HW4 = HW // 4
    c8, c2 = C // 8, C // 2
    ctot = 2 * c8 + c2
    assert H % 2 == 0 and W % 2 == 0 and C % 8 == 0

    gen = _tpu_generation()

    # Per-generation tiling / VMEM budget:
    #  * v7x: 64 MiB physical VMEM -> cap tq at 256, modest scoped limit.
    #  * v5e/v6e: 128 MiB physical -> larger tq and a roomy explicit limit
    #    (v5e's default scoped VMEM is only 16 MiB).
    if gen == "v7":
        tq_candidates = (256, 128)
        vmem_limit = 40 * 1024 * 1024
    else:
        tq_candidates = (512, 256, 128)
        vmem_limit = 64 * 1024 * 1024

    if tq is None:
        tq = HW
        for cand in tq_candidates:
            if HW % cand == 0:
                tq = cand
                break
    assert HW % tq == 0 and tq % 8 == 0
    n_q = HW // tq

    # v6e is HBM-bandwidth-bound for this kernel: stream x as bf16 there.
    # v5e/v7x are compute-bound -> keep f32 x (exact residual term).
    if x_bf16 is None:
        x_bf16 = (gen == "v6")
    x_dtype = jnp.bfloat16 if x_bf16 else jnp.float32

    # Layout plumbing (wrapper side): pixels x channels activations,
    # pre-transposed bf16 weights, theta/phi/g fused into one projection.
    x_flat = jnp.transpose(x, (0, 2, 3, 1)).reshape(B, HW, C).astype(x_dtype)
    w_all = jnp.concatenate([jnp.asarray(wt, jnp.bfloat16).T,
                             jnp.asarray(wp, jnp.bfloat16).T,
                             jnp.asarray(wg, jnp.bfloat16).T], axis=1)  # (C, ctot)
    wo_t = jnp.asarray(wo, jnp.bfloat16).T                              # (c2, C)
    gamma_arr = jnp.asarray(gamma, jnp.float32).reshape(1)

    # x and the weights have index maps constant along the query-tile axis;
    # on v7x drop their redundant second pipeline buffer to free VMEM.
    single = (gen == "v7")

    def bspec(shape, index_map, *, single_buffer=False):
        if single_buffer:
            try:
                return pl.BlockSpec(shape, index_map,
                                    pipeline_mode=pl.Buffered(1))
            except (TypeError, AttributeError):
                pass  # older Pallas without pipeline_mode: default buffering
        return pl.BlockSpec(shape, index_map)

    flops = 2 * B * HW * (C * ctot + HW4 * c8 + HW4 * c2 + c2 * C)
    bytes_accessed = (B * HW * C * (x_flat.dtype.itemsize + 4)
                      + 2 * (C * ctot + c2 * C) + 4)
    cost = pl.CostEstimate(flops=flops,
                           transcendentals=B * HW * HW4,
                           bytes_accessed=bytes_accessed)

    out_flat = pl.pallas_call(
        attention_kernel,
        out_shape=jax.ShapeDtypeStruct((B, HW, C), jnp.float32),
        grid_spec=pltpu.PrefetchScalarGridSpec(
            num_scalar_prefetch=0,
            grid=(B, n_q),
            in_specs=[
                pl.BlockSpec(memory_space=pltpu.MemorySpace.SMEM),        # gamma
                bspec((1, HW, C), lambda b, j: (b, 0, 0),
                      single_buffer=single),                              # x_flat
                bspec((C, ctot), lambda b, j: (0, 0),
                      single_buffer=single),                              # [Wt|Wp|Wg]^T
                bspec((c2, C), lambda b, j: (0, 0),
                      single_buffer=single),                              # Wo^T
            ],
            out_specs=pl.BlockSpec((1, tq, C), lambda b, j: (b, j, 0)),
            scratch_shapes=[
                pltpu.VMEM((HW, ctot), jnp.float32),         # fused conv output
                pltpu.VMEM((H, W // 2, ctot), jnp.float32),  # horizontally pooled
                pltpu.VMEM((HW, c8), jnp.bfloat16),          # theta (full res)
                pltpu.VMEM((HW4, c8), jnp.bfloat16),         # pooled phi
                pltpu.VMEM((HW4, c2), jnp.bfloat16),         # pooled g
            ],
        ),
        compiler_params=pltpu.CompilerParams(
            dimension_semantics=("parallel", "arbitrary"),
            vmem_limit_bytes=vmem_limit,
        ),
        cost_estimate=cost,
    )(gamma_arr, x_flat, w_all, wo_t)

    # back to NCHW
    return jnp.transpose(out_flat.reshape(B, H, W, C), (0, 3, 1, 2))


def attention_ref(x, wt, wp, wg, wo, gamma):
    """Pure-JAX NCHW f32 reference mirroring the PyTorch forward."""
    B, C, H, W = x.shape

    def conv1x1(t, w):  # (B, Cin, H, W) x (Cout, Cin) -> (B, Cout, H, W)
        return jnp.einsum('bchw,oc->bohw', t, w)

    def pool2x2(t):
        Bb, O, Hh, Ww = t.shape
        return t.reshape(Bb, O, Hh // 2, 2, Ww // 2, 2).max(axis=(3, 5))

    theta = conv1x1(x, wt).reshape(B, C // 8, H * W)
    phi = pool2x2(conv1x1(x, wp)).reshape(B, C // 8, H * W // 4)
    g = pool2x2(conv1x1(x, wg)).reshape(B, C // 2, H * W // 4)
    beta = jax.nn.softmax(jnp.einsum('bcn,bcm->bnm', theta, phi), axis=-1)
    o_mid = jnp.einsum('bcm,bnm->bcn', g, beta).reshape(B, C // 2, H, W)
    o = conv1x1(o_mid, wo)
    return gamma * o + x


if __name__ == "__main__":
    B, C, H, W = 2, 32, 16, 16    # ch=32 -> ch//8=4, ch//2=16, HW=256

    key = jax.random.PRNGKey(0)
    kx, kt, kp, kg, ko = jax.random.split(key, 5)
    x = jax.random.normal(kx, (B, C, H, W), jnp.float32)
    # 1x1 conv weights have shape (C_out, C_in) (kernel dims are 1x1, no bias)
    wt = jax.random.normal(kt, (C // 8, C), jnp.float32) * 0.1
    wp = jax.random.normal(kp, (C // 8, C), jnp.float32) * 0.1
    wg = jax.random.normal(kg, (C // 2, C), jnp.float32) * 0.1
    wo = jax.random.normal(ko, (C, C // 2), jnp.float32) * 0.1
    # PyTorch inits gamma=0 (output == x); use a nonzero deterministic value so
    # the attention path is actually exercised.
    gamma = 0.5

    # tq=128 -> grid=(2, 2): exercises the query-tiled path and scratch reuse.
    run = jax.jit(functools.partial(attention_pallas, tq=128))
    out = jax.block_until_ready(run(x, wt, wp, wg, wo, gamma))

    ref = attention_ref(x, wt, wp, wg, wo, gamma)
    assert out.shape == (B, C, H, W)
    assert jnp.allclose(out, ref, rtol=2e-2, atol=2e-2), (
        float(jnp.max(jnp.abs(out - ref))))

    print("KERNEL_OK")
</pallas_src>

<mosaic_0001>
module attributes {stable_mosaic.version = 11 : i64} {
  func.func @attention_kernel(%arg0: i32, %arg1: i32, %arg2: memref<1xf32, #tpu.memory_space<smem>>, %arg3: memref<1x256x32xf32, #tpu.memory_space<vmem>>, %arg4: memref<32x24xbf16, #tpu.memory_space<vmem>>, %arg5: memref<16x32xbf16, #tpu.memory_space<vmem>>, %arg6: memref<1x128x32xf32, #tpu.memory_space<vmem>>, %arg7: memref<256x24xf32, #tpu.memory_space<vmem>>, %arg8: memref<16x8x24xf32, #tpu.memory_space<vmem>>, %arg9: memref<256x4xbf16, #tpu.memory_space<vmem>>, %arg10: memref<64x4xbf16, #tpu.memory_space<vmem>>, %arg11: memref<64x16xbf16, #tpu.memory_space<vmem>>) attributes {dimension_semantics = [#tpu.dimension_semantics<parallel>, #tpu.dimension_semantics<arbitrary>], iteration_bounds = array<i64: 2, 2>, scalar_prefetch = 0 : i64, scratch_operands = 5 : i64, tpu.core_type = #tpu.core_type<tc>, window_params = [{transform_indices = @transform_0, window_bounds = array<i64: 1>}, {transform_indices = @transform_1, window_bounds = array<i64: 1, 256, 32>}, {pipeline_mode = #tpu.pipeline_mode<synchronous>, transform_indices = @transform_2, window_bounds = array<i64: 32, 24>}, {pipeline_mode = #tpu.pipeline_mode<synchronous>, transform_indices = @transform_3, window_bounds = array<i64: 16, 32>}, {transform_indices = @transform_4, window_bounds = array<i64: 1, 128, 32>}]} {
    %c0_i32 = arith.constant 0 : i32
    %0 = arith.cmpi eq, %arg1, %c0_i32 : i32
    %1 = arith.extui %0 : i1 to i32
    %c0_i32_0 = arith.constant 0 : i32
    %2 = arith.cmpi ne, %1, %c0_i32_0 : i32
    scf.if %2 {
      %c0_17 = arith.constant 0 : index
      %c0_18 = arith.constant 0 : index
      %c0_19 = arith.constant 0 : index
      %35 = vector.load %arg3[%c0_17, %c0_18, %c0_19] : memref<1x256x32xf32, #tpu.memory_space<vmem>>, vector<1x256x32xf32>
      %36 = vector.shape_cast %35 : vector<1x256x32xf32> to vector<256x32xf32>
      %37 = arith.truncf %36 : vector<256x32xf32> to vector<256x32xbf16>
      %c0_20 = arith.constant 0 : index
      %c0_21 = arith.constant 0 : index
      %38 = vector.load %arg4[%c0_20, %c0_21] : memref<32x24xbf16, #tpu.memory_space<vmem>>, vector<32x24xbf16>
      %cst_22 = arith.constant dense<0.000000e+00> : vector<256x24xf32>
      %39 = tpu.matmul %37, %38, %cst_22 {dimension_numbers = #tpu.dot_dimension_numbers<[1], [0], [0], [1], [0, 0, 1, 1], [], []>} : vector<256x32xbf16>, vector<32x24xbf16>, vector<256x24xf32> -> vector<256x24xf32>
      %40 = vector.extract_strided_slice %39 {offsets = [0, 0], sizes = [256, 4], strides = [1, 1]} : vector<256x24xf32> to vector<256x4xf32>
      %41 = arith.truncf %40 : vector<256x4xf32> to vector<256x4xbf16>
      %c0_23 = arith.constant 0 : index
      %c0_24 = arith.constant 0 : index
      %42 = vector.load %arg9[%c0_23, %c0_24] : memref<256x4xbf16, #tpu.memory_space<vmem>>, vector<256x4xbf16>
      tpu.vector_store %arg9[%c0_23, %c0_24], %41 {strides = array<i32>} : memref<256x4xbf16, #tpu.memory_space<vmem>>, vector<256x4xbf16>,
      %c0_25 = arith.constant 0 : index
      %c0_26 = arith.constant 0 : index
      %43 = vector.load %arg7[%c0_25, %c0_26] : memref<256x24xf32, #tpu.memory_space<vmem>>, vector<256x24xf32>
      tpu.vector_store %arg7[%c0_25, %c0_26], %39 {strides = array<i32>} : memref<256x24xf32, #tpu.memory_space<vmem>>, vector<256x24xf32>,
      %c0_27 = arith.constant 0 : index
      %c0_28 = arith.constant 0 : index
      %44 = tpu.strided_load %arg7[%c0_27, %c0_28] {strides = array<i32: 2, 1>} : memref<256x24xf32, #tpu.memory_space<vmem>>, vector<128x24xf32>
      %c1 = arith.constant 1 : index
      %c0_29 = arith.constant 0 : index
      %45 = tpu.strided_load %arg7[%c1, %c0_29] {strides = array<i32: 2, 1>} : memref<256x24xf32, #tpu.memory_space<vmem>>, vector<128x24xf32>
      %46 = arith.maximumf %44, %45 : vector<128x24xf32>
      %47 = vector.shape_cast %46 : vector<128x24xf32> to vector<16x8x24xf32>
      %c0_30 = arith.constant 0 : index
      %c0_31 = arith.constant 0 : index
      %c0_32 = arith.constant 0 : index
      %48 = vector.load %arg8[%c0_30, %c0_31, %c0_32] : memref<16x8x24xf32, #tpu.memory_space<vmem>>, vector<16x8x24xf32>
      tpu.vector_store %arg8[%c0_30, %c0_31, %c0_32], %47 {strides = array<i32>} : memref<16x8x24xf32, #tpu.memory_space<vmem>>, vector<16x8x24xf32>,
      %c0_33 = arith.constant 0 : index
      %c0_34 = arith.constant 0 : index
      %c0_35 = arith.constant 0 : index
      %49 = tpu.strided_load %arg8[%c0_33, %c0_34, %c0_35] {strides = array<i32: 2, 1, 1>} : memref<16x8x24xf32, #tpu.memory_space<vmem>>, vector<8x8x24xf32>
      %c1_36 = arith.constant 1 : index
      %c0_37 = arith.constant 0 : index
      %c0_38 = arith.constant 0 : index
      %50 = tpu.strided_load %arg8[%c1_36, %c0_37, %c0_38] {strides = array<i32: 2, 1, 1>} : memref<16x8x24xf32, #tpu.memory_space<vmem>>, vector<8x8x24xf32>
      %51 = arith.maximumf %49, %50 : vector<8x8x24xf32>
      %52 = vector.shape_cast %51 : vector<8x8x24xf32> to vector<64x24xf32>
      %53 = vector.extract_strided_slice %52 {offsets = [0, 4], sizes = [64, 4], strides = [1, 1]} : vector<64x24xf32> to vector<64x4xf32>
      %54 = arith.truncf %53 : vector<64x4xf32> to vector<64x4xbf16>
      %c0_39 = arith.constant 0 : index
      %c0_40 = arith.constant 0 : index
      %55 = vector.load %arg10[%c0_39, %c0_40] : memref<64x4xbf16, #tpu.memory_space<vmem>>, vector<64x4xbf16>
      tpu.vector_store %arg10[%c0_39, %c0_40], %54 {strides = array<i32>} : memref<64x4xbf16, #tpu.memory_space<vmem>>, vector<64x4xbf16>,
      %56 = vector.extract_strided_slice %52 {offsets = [0, 8], sizes = [64, 16], strides = [1, 1]} : vector<64x24xf32> to vector<64x16xf32>
      %57 = arith.truncf %56 : vector<64x16xf32> to vector<64x16xbf16>
      %c0_41 = arith.constant 0 : index
      %c0_42 = arith.constant 0 : index
      %58 = vector.load %arg11[%c0_41, %c0_42] : memref<64x16xbf16, #tpu.memory_space<vmem>>, vector<64x16xbf16>
      tpu.vector_store %arg11[%c0_41, %c0_42], %57 {strides = array<i32>} : memref<64x16xbf16, #tpu.memory_space<vmem>>, vector<64x16xbf16>,
    } else {
    }
    %c128_i32 = arith.constant 128 : i32
    %3 = arith.muli %arg1, %c128_i32 : i32
    %4 = tpu.assume_multiple %3, 128 : i32
    %5 = arith.index_cast %4 : i32 to index
    %c0 = arith.constant 0 : index
    %6 = vector.load %arg9[%5, %c0] : memref<256x4xbf16, #tpu.memory_space<vmem>>, vector<128x4xbf16>
    %c0_1 = arith.constant 0 : index
    %c0_2 = arith.constant 0 : index
    %7 = vector.load %arg10[%c0_1, %c0_2] : memref<64x4xbf16, #tpu.memory_space<vmem>>, vector<64x4xbf16>
    %cst = arith.constant dense<0.000000e+00> : vector<128x64xf32>
    %8 = tpu.matmul %6, %7, %cst {dimension_numbers = #tpu.dot_dimension_numbers<[1], [1], [0], [0], [0, 0, 1, 0], [], []>} : vector<128x4xbf16>, vector<64x4xbf16>, vector<128x64xf32> -> vector<128x64xf32>
    %cst_3 = arith.constant dense<0xFF800000> : vector<128xf32>
    %9 = vector.multi_reduction <maximumf>, %8, %cst_3 [1] : vector<128x64xf32> to vector<128xf32>
    %10 = vector.shape_cast %9 : vector<128xf32> to vector<128x1xf32>
    %11 = vector.broadcast %10 : vector<128x1xf32> to vector<128x64xf32>
    %12 = arith.subf %8, %11 : vector<128x64xf32>
    %13 = math.exp %12 : vector<128x64xf32>
    %cst_4 = arith.constant dense<0.000000e+00> : vector<128xf32>
    %14 = vector.multi_reduction <add>, %13, %cst_4 [1] : vector<128x64xf32> to vector<128xf32>
    %15 = vector.shape_cast %14 : vector<128xf32> to vector<128x1xf32>
    %16 = arith.truncf %13 : vector<128x64xf32> to vector<128x64xbf16>
    %c0_5 = arith.constant 0 : index
    %c0_6 = arith.constant 0 : index
    %17 = vector.load %arg11[%c0_5, %c0_6] : memref<64x16xbf16, #tpu.memory_space<vmem>>, vector<64x16xbf16>
    %cst_7 = arith.constant dense<0.000000e+00> : vector<128x16xf32>
    %18 = tpu.matmul %16, %17, %cst_7 {dimension_numbers = #tpu.dot_dimension_numbers<[1], [0], [0], [1], [0, 0, 1, 1], [], []>} : vector<128x64xbf16>, vector<64x16xbf16>, vector<128x16xf32> -> vector<128x16xf32>
    %19 = tpu.reciprocal %15 {approx = true} : vector<128x1xf32> -> vector<128x1xf32>
    %20 = vector.broadcast %19 : vector<128x1xf32> to vector<128x16xf32>
    %21 = arith.mulf %18, %20 : vector<128x16xf32>
    %22 = arith.truncf %21 : vector<128x16xf32> to vector<128x16xbf16>
    %c0_8 = arith.constant 0 : index
    %c0_9 = arith.constant 0 : index
    %23 = vector.load %arg5[%c0_8, %c0_9] : memref<16x32xbf16, #tpu.memory_space<vmem>>, vector<16x32xbf16>
    %cst_10 = arith.constant dense<0.000000e+00> : vector<128x32xf32>
    %24 = tpu.matmul %22, %23, %cst_10 {dimension_numbers = #tpu.dot_dimension_numbers<[1], [0], [0], [1], [0, 0, 1, 1], [], []>} : vector<128x16xbf16>, vector<16x32xbf16>, vector<128x32xf32> -> vector<128x32xf32>
    %c0_11 = arith.constant 0 : index
    %25 = arith.index_cast %4 : i32 to index
    %c0_12 = arith.constant 0 : index
    %26 = vector.load %arg3[%c0_11, %25, %c0_12] : memref<1x256x32xf32, #tpu.memory_space<vmem>>, vector<1x128x32xf32>
    %27 = vector.shape_cast %26 : vector<1x128x32xf32> to vector<128x32xf32>
    %c0_13 = arith.constant 0 : index
    %28 = memref.load %arg2[%c0_13] : memref<1xf32, #tpu.memory_space<smem>>
    %29 = vector.broadcast %28 : f32 to vector<128x32xf32>
    %30 = arith.mulf %29, %24 : vector<128x32xf32>
    %31 = arith.addf %30, %27 : vector<128x32xf32>
    %c0_14 = arith.constant 0 : index
    %c0_15 = arith.constant 0 : index
    %c0_16 = arith.constant 0 : index
    %32 = vector.load %arg6[%c0_14, %c0_15, %c0_16] : memref<1x128x32xf32, #tpu.memory_space<vmem>>, vector<1x128x32xf32>
    %33 = vector.shape_cast %32 : vector<1x128x32xf32> to vector<128x32xf32>
    %34 = vector.shape_cast %31 : vector<128x32xf32> to vector<1x128x32xf32>
    tpu.vector_store %arg6[%c0_14, %c0_15, %c0_16], %34 {strides = array<i32>} : memref<1x128x32xf32, #tpu.memory_space<vmem>>, vector<1x128x32xf32>,
    return
  }
  func.func @transform_0(%arg0: i32, %arg1: i32) -> i32 {
    %c0_i32 = arith.constant 0 : i32
    %c0_i32_0 = arith.constant 0 : i32
    return %c0_i32 : i32
  }
  func.func @transform_1(%arg0: i32, %arg1: i32) -> (i32, i32, i32) {
    %c0_i32 = arith.constant 0 : i32
    %c0_i32_0 = arith.constant 0 : i32
    %c0_i32_1 = arith.constant 0 : i32
    return %arg0, %c0_i32, %c0_i32_0 : i32, i32, i32
  }
  func.func @transform_2(%arg0: i32, %arg1: i32) -> (i32, i32) {
    %c0_i32 = arith.constant 0 : i32
    %c0_i32_0 = arith.constant 0 : i32
    %c0_i32_1 = arith.constant 0 : i32
    return %c0_i32, %c0_i32_0 : i32, i32
  }
  func.func @transform_3(%arg0: i32, %arg1: i32) -> (i32, i32) {
    %c0_i32 = arith.constant 0 : i32
    %c0_i32_0 = arith.constant 0 : i32
    %c0_i32_1 = arith.constant 0 : i32
    return %c0_i32, %c0_i32_0 : i32, i32
  }
  func.func @transform_4(%arg0: i32, %arg1: i32) -> (i32, i32, i32) {
    %c0_i32 = arith.constant 0 : i32
    %c0_i32_0 = arith.constant 0 : i32
    return %arg0, %arg1, %c0_i32 : i32, i32, i32
  }
}

</mosaic_0001>

<bundles_post_ra>
// kernel: attention_pallas.1
= control target key start
LH: loop header
LB: loop body
LE: loop exit
PB: predicated region body
PF: predicated region fallthrough
CT: control target
= control target key end

     0   :  { %s3067_s0 = inlined_call_operand.<no memory space> [shape: f32[1], index: 0, kind: input, shape index: {}]   ;;  %s3068_s1 = inlined_call_operand.hbm [shape: f32[2,256,32], index: 1, kind: input, shape index: {}]   ;;  %s3069_s2 = inlined_call_operand.vmem [shape: bf16[32,24], index: 2, kind: input, shape index: {}]   ;;  %s3070_s3 = inlined_call_operand.vmem [shape: bf16[16,32], index: 3, kind: input, shape index: {}]   ;;  %s3071_s4 = inlined_call_operand.hbm [shape: f32[2,256,32], index: 4, kind: output, shape index: {}]  }
   0x1   :  { %9 = sst [smem:[#allocation7]] %s3067_s0 }
   0x2   :  { %10 = vsyncpa [#allocation9], 0 }
   0x3   :  { %12 = vsyncpa [#allocation9 + $0x1], 0 }
   0x4   :  { %13 = vsyncpa [#allocation10], 0 }
   0x5   :  { %15 = vsyncpa [#allocation10 + $0x1], 0  ;;  %s2493_s17 = smov 0   ;;  %s2495_s18 = smov 0  }
   0x6   :  { %s2497_s19 = smov 0   ;;  %s2499_s20 = smov 0  }
   0x7   :  { %s2501_s21 = smov 0   ;;  %s2503_s22 = smov 0  }
   0x8   :  { %s2505_s23 = smov 0   ;;  %s2507_s24 = smov 0  }
   0x9   :  { %s2509_s0 = smov 0   ;;  %s2511_s25 = smov 0  }
   0xa   :  { %s2513_s26 = smov 0  }
   0xb LB: > { %3075 = sst [smem:[#allocation14_spill]] %s2451_s25  ;;  %s1788_s27 = sadd.s32 4294967295, %s2455_s26   ;;  %s2455_s26 = sphi %s2513_s26, %s21_s26   ;;  %s2451_s25 = sphi %s2511_s25, %s3085_s25   ;;  %s2447_s0 = sphi %s2509_s0, %s3093_s0   ;;  %s2443_s24 = sphi %s2507_s24, %s3083_s24   ;;  %s2439_s23 = sphi %s2505_s23, %s3092_s23   ;;  %s2435_s22 = sphi %s2503_s22, %s3091_s22   ;;  %s2431_s21 = sphi %s2501_s21, %s3090_s21   ;;  %s2427_s20 = sphi %s2499_s20, %s3089_s20   ;;  %s2423_s19 = sphi %s2497_s19, %s3088_s19   ;;  %s2419_s18 = sphi %s2495_s18, %s3087_s18   ;;  %s2415_s17 = sphi %s2493_s17, %s3086_s17  }
   0xc   : > { %s1789_s28 = sadd.s32 4294967294, %s2455_s26   ;;  %s30_s29 = sadd.s32 1, %s2447_s0 }
   0xd   : > { %s33_s30 = sadd.s32 1, %s2451_s25  ;;  %p31_p0 = scmp.ge.s32.totalorder %s30_s29, 2 }
   0xe   : > { %s61_s5 = sadd.s32 1, %s2435_s22  ;;  %p68_p1 = scmp.ne.s32.totalorder %s2435_s22, %s2431_s21 }
   0xf   : > { %p69_p2 = scmp.eq.s32.totalorder %s2455_s26, 0  ;;  %s3095_s29 = smov (%p31_p0, %s30_s29), 0 }
  0x10   : > { %3076 = sst [smem:[#allocation15_spill]] %s3095_s29  ;;  %s3097_s30 = smov (!%p31_p0, %s33_s30), %s2451_s25 }
  0x11   : > { %p2557_p3 = por %p69_p2, %p68_p1  ;;  %p74_p4 = scmp.ne.s32.totalorder %s2431_s21, %s2427_s20 }
  0x12   : > { %p35_p5 = scmp.ge.s32.totalorder %s3097_s30, 2  ;;  %p75_p6 = scmp.eq.s32.totalorder %s1788_s27, 0 }
  0x13   : > { %s127_s7 = ssub.s32 %s2447_s0, %s3095_s29  ;;  %s131_s8 = sadd.s32 1, %s2423_s19 }
  0x14   : > { %s3099_s30 = smov (%p35_p5, %s3097_s30), 0  ;;  %p2567_p7 = por %p75_p6, %p74_p4 }
  0x15   : > { %3078 = sst [smem:[#allocation16_spill]] %s3099_s30  ;;  %p141_p8 = scmp.ne.s32.totalorder %s2423_s19, %s2419_s18 }
  0x16   : > { %s58_s10 = ssub.s32 %s2451_s25, %s3099_s30  ;;  %p142_p9 = scmp.eq.s32.totalorder %s1788_s27, 3 }
  0x17   : > { %p59_p10 = scmp.eq.s32.totalorder %s58_s10, 0  ;;  %s128_s11 = sor.u32 %s127_s7, %s58_s10 }
  0x18   : > { %p129_p11 = scmp.eq.s32.totalorder %s128_s11, 0  ;;  %p2575_p12 = por %p142_p9, %p141_p8 }
  0x19   : > { %s2580_s13 = scalar_select %p59_p10, %s2435_s22, %s61_s5  }
  0x1a   : > { %s2583_s14 = scalar_select %p129_p11, %s2423_s19, %s131_s8  }
  0x1b   : > { %p147_p13 = scmp.ne.s32.totalorder %s2419_s18, %s2415_s17  ;;  %p148_p0 = scmp.eq.s32.totalorder %s1789_s28, 3 }
  0x1c   : > { %p2128_p1 = scmp.lt.s32.totalorder %s2455_s26, 4  ;;  %s177_s16 = sand.u32 1, %s2435_s22  }
  0x1d   : > { %p2588_p2 = por %p148_p0, %p147_p13  ;;  %s1792_s20 = sshll.u32 %s177_s16, 8 }
  0x1e   : > { %s1906_s27 = sshll.u32 %s2451_s25, 12  ;;  %s181_s30 = scalar_lea.vmem [#allocation8], %s1792_s20 }
  0x1f   : > { %s187_s11 = scalar_lea.hbm %s3068_s1, %s1906_s27  ;;  %s188_s29 = sshll.u32 %s181_s30, 4  ;;  %s189_s29 = int_to_ptr.vmem [resolvable:$true] %s188_s29 }
  0x20   : > { %p2599_p4 = pnand %p2128_p1, %p2557_p3  ;;  %p1795_p5 = scmp.ge.s32.totalorder %s2455_s26, 1 }
  0x21   : > { %s178_s28 = scalar_lea.sflag [#allocation9], %s177_s16  ;;  %s2320_s8 = scalar_lea.vmem %s189_s29, 4096 }
  0x22   : > { %p2309_p6 = pneg %p2599_p4  ;;  %p2321_p8 = scmp.ne.s32.totalorder %s189_s29, %s2320_s8 }
  0x23   : > { %s2457_s25 = smov [#allocation8]  }
  0x24   : > { %p2323_p9 = pnand %p2321_p8, %p2309_p6  ;;  %s2325_s7 = sshll.u32 %s2457_s25, 4  ;;  %s2326_s7 = int_to_ptr.vmem [resolvable:$false] %s2325_s7 }
  0x25   : > { %s2327_s20 = scalar_lea.vmem %s2326_s7, 8192  ;;  %p2328_p11 = scmp.lt.s32.totalorder %s189_s29, %s2326_s7 }
  0x26   : > { %p2324_p10 = pneg %p2323_p9  ;;  %p2329_p13 = scmp.lt.s32.totalorder %s2327_s20, %s2320_s8 }
  0x28   : > { %p2330_p0 = por %p2329_p13, %p2328_p11 }
  0x2a   : > { %p2331_p3 = pnand %p2330_p0, %p2324_p10 }
  0x2c   : > { %2334 = shalt.err (!%p2331_p3)
}
  0x2d   : > { %s2458_s30 = smov 128   ;;  %s2459_s6 = smov 8  }
  0x2e   : > { %2123 = dma.hbm_to_vmem [thread:$0]  (!%p2599_p4), %s187_s11, 4096, %s189_s29, %s178_s28, %s2458_s30, %s2458_s30, %s2459_s6  }
  0x2f   : > { %p196_p1 = scmp.lt.s32.totalorder %s2455_s26, 5 }
  0x31   : > { %p197_p6 = pnand %p1795_p5, %p196_p1 }
  0x32   : > { %s202_s25 = sand.u32 (!%p197_p6), 1, %s2431_s21  }
  0x33   : > { %200 = sbr.rel (%p197_p6) target bundleno = 1293 (0x50d), region = 36  ;;  %s1796_s16 = sshll.u32 (!%p197_p6), %s202_s25, 8 }
  0x34   : > { %s203_s27 = scalar_lea.sflag (!%p197_p6), [#allocation9], %s202_s25  ;;  %s2612_s10 = scalar_lea.vmem (!%p197_p6), [#allocation8], %s1796_s16 }
  0x38   : > { %2406 = dma.done.wait (%p2567_p7), %s203_s27, 4096  }
  0x39   : > { %2408 = vsyncadd (%p2567_p7), %s203_s27, 4294963200  ;;  %s228_s5 = sand.u32 1, %s2419_s18   ;;  %p1798_p4 = scmp.ne.s32.totalorder %s2439_s23, 0 }
  0x3a   : > { %s1797_s29 = sshll.u32 %s228_s5, 7  ;;  %s2460_s20 = smov (!%p1798_p4), 124  }
  0x3b   : > { %s2621_s11 = scalar_lea.vmem [#allocation11], %s1797_s29  ;;  %236 = sbr.rel (%p1798_p4) target bundleno = 452 (0x1c4), region = 44 }
  0x3c   : > { %s2461_s30 = smov (!%p1798_p4), 120  }
  0x40   : > { %v2224_v0 = vld [vmem:[%s3069_s2 + $0x8] sm:$0xff]   ;;  %v2225_v1 = vld [vmem:[%s3069_s2] sm:$0xff]   ;;  %vm301_vm0 = vcmask 261120   ;;  %v239_v7 = vld [vmem:[%s2612_s10 + $0x10] sm:$0xff]  ;;  %vm672_vm1 = vcmask 195584   ;;  %vm639_vm2 = vcmask 27648  }
  0x41   : > { %1998 = vmatprep.subr.bf16.mxu0 %v2224_v0  ;;  %2100 = vmatprep.subr.bf16.mxu1 %v2224_v0  ;;  %v237_v2 = vld [vmem:[%s2612_s10] sm:$0xff]  ;;  %v238_v3 = vld [vmem:[%s2612_s10 + $0x8] sm:$0xff]  ;;  %v240_v8 = vld [vmem:[%s2612_s10 + $0x18] sm:$0xff]  ;;  %vm905_vm3 = vcmask 125952  }
  0x42   : > { %v253_v4 = vld [vmem:[%s2612_s10 + $0x80] sm:$0xff]  ;;  %1999 = vmatpush3.bf16.msra.mxu0 %v2224_v0  ;;  %2102 = vmatpush3.bf16.msra.mxu1 %v2224_v0  ;;  %v269_v5 = vpack.c.bf16 %v238_v3, %v237_v2  ;;  %v254_v6 = vld [vmem:[%s2612_s10 + $0x88] sm:$0xff]  ;;  %v255_v10 = vld [vmem:[%s2612_s10 + $0x90] sm:$0xff]  ;;  %v270_v16 = vpack.c.bf16 %v240_v8, %v239_v7 }
  0x43   : > { %2000 = vmatprep.subr.bf16.mxu0 %v2225_v1  ;;  %2101 = vmatprep.subr.bf16.mxu1 %v2225_v1  ;;  %v277_v9 = vpack.c.bf16 %v254_v6, %v253_v4  ;;  %v256_v11 = vld [vmem:[%s2612_s10 + $0x98] sm:$0xff]  ;;  %v241_v12 = vld [vmem:[%s2612_s10 + $0x20] sm:$0xff]  ;;  %v242_v13 = vld [vmem:[%s2612_s10 + $0x28] sm:$0xff] }
  0x44   : > { %2002 = vmatprep.mubr.msk.bf16.mxu0 %vm301_vm0, %v269_v5  ;;  %v257_v14 = vld [vmem:[%s2612_s10 + $0xa0] sm:$0xff]  ;;  %v258_v15 = vld [vmem:[%s2612_s10 + $0xa8] sm:$0xff]  ;;  %v278_v17 = vpack.c.bf16 %v256_v11, %v255_v10  ;;  %v271_v18 = vpack.c.bf16 %v242_v13, %v241_v12  ;;  %v243_v20 = vld [vmem:[%s2612_s10 + $0x30] sm:$0xff] }
  0x45   : > { %2018 = vmatprep.mubr.msk.bf16.mxu1 %vm301_vm0, %v277_v9  ;;  %v279_v19 = vpack.c.bf16 %v258_v15, %v257_v14  ;;  %v244_v21 = vld [vmem:[%s2612_s10 + $0x38] sm:$0xff]  ;;  %v259_v22 = vld [vmem:[%s2612_s10 + $0xb0] sm:$0xff]  ;;  %v245_v24 = vld [vmem:[%s2612_s10 + $0x40] sm:$0xff] }
  0x46   : > { %2001 = vmatpush3.bf16.msra.mxu0 %v2225_v1  ;;  %2103 = vmatpush3.bf16.msra.mxu1 %v2225_v1  ;;  %v260_v23 = vld [vmem:[%s2612_s10 + $0xb8] sm:$0xff]  ;;  %v246_v25 = vld [vmem:[%s2612_s10 + $0x48] sm:$0xff]  ;;  %v261_v26 = vld [vmem:[%s2612_s10 + $0xc0] sm:$0xff]  ;;  %v272_v28 = vpack.c.bf16 %v244_v21, %v243_v20 }
  0x47   : > { %v262_v27 = vld [vmem:[%s2612_s10 + $0xc8] sm:$0xff]  ;;  %v280_v29 = vpack.c.bf16 %v260_v23, %v259_v22  ;;  %v273_v30 = vpack.c.bf16 %v246_v25, %v245_v24  ;;  %v247_v32 = vld [vmem:[%s2612_s10 + $0x50] sm:$0xff]  ;;  %v248_v33 = vld [vmem:[%s2612_s10 + $0x58] sm:$0xff] }
  0x48   : > { %v281_v31 = vpack.c.bf16 %v262_v27, %v261_v26  ;;  %v263_v34 = vld [vmem:[%s2612_s10 + $0xd0] sm:$0xff]  ;;  %v264_v35 = vld [vmem:[%s2612_s10 + $0xd8] sm:$0xff]  ;;  %v249_v36 = vld [vmem:[%s2612_s10 + $0x60] sm:$0xff]  ;;  %v274_v40 = vpack.c.bf16 %v248_v33, %v247_v32 }
  0x49   : > { %2003 = vmatmul.mubr.msk.bf16.vlgmr.msra.gmra.mxu0 %vm301_vm0, %v270_v16  ;;  %2019 = vmatmul.mubr.msk.bf16.vlgmr.msra.gmra.mxu1 %vm301_vm0, %v278_v17  ;;  %v250_v37 = vld [vmem:[%s2612_s10 + $0x68] sm:$0xff]  ;;  %v265_v38 = vld [vmem:[%s2612_s10 + $0xe0] sm:$0xff]  ;;  %v282_v41 = vpack.c.bf16 %v264_v35, %v263_v34  ;;  %v251_v44 = vld [vmem:[%s2612_s10 + $0x70] sm:$0xff] }
  0x4a   : > { %2006 = vmatprep.mubr.msk.bf16.mxu0 %vm301_vm0, %v271_v18  ;;  %2022 = vmatprep.mubr.msk.bf16.mxu1 %vm301_vm0, %v279_v19  ;;  %v266_v39 = vld [vmem:[%s2612_s10 + $0xe8] sm:$0xff]  ;;  %v275_v42 = vpack.c.bf16 %v250_v37, %v249_v36  ;;  %v252_v45 = vld [vmem:[%s2612_s10 + $0x78] sm:$0xff]  ;;  %v267_v46 = vld [vmem:[%s2612_s10 + $0xf0] sm:$0xff] }
  0x4b   : > { %v283_v43 = vpack.c.bf16 %v266_v39, %v265_v38  ;;  %v268_v47 = vld [vmem:[%s2612_s10 + $0xf8] sm:$0xff]  ;;  %v276_v48 = vpack.c.bf16 %v252_v45, %v251_v44 }
  0x4c   : > { %v284_v49 = vpack.c.bf16 %v268_v47, %v267_v46 }
  0x51   : > { %2007 = vmatmul.mubr.msk.bf16.gmra.mxu0 %vm301_vm0, %v272_v28  ;;  %2023 = vmatmul.mubr.msk.bf16.gmra.mxu1 %vm301_vm0, %v280_v29 }
  0x52   : > { %2010 = vmatprep.mubr.msk.bf16.mxu0 %vm301_vm0, %v273_v30  ;;  %2026 = vmatprep.mubr.msk.bf16.mxu1 %vm301_vm0, %v281_v31 }
  0x59   : > { %2011 = vmatmul.mubr.msk.bf16.gmra.mxu0 %vm301_vm0, %v274_v40  ;;  %2027 = vmatmul.mubr.msk.bf16.gmra.mxu1 %vm301_vm0, %v282_v41 }
  0x5a   : > { %2014 = vmatprep.mubr.msk.bf16.mxu0 %vm301_vm0, %v275_v42  ;;  %2030 = vmatprep.mubr.msk.bf16.mxu1 %vm301_vm0, %v283_v43 }
  0x61   : > { %2015 = vmatmul.mubr.msk.bf16.gmra.mxu0 %vm301_vm0, %v276_v48  ;;  %2031 = vmatmul.mubr.msk.bf16.gmra.mxu1 %vm301_vm0, %v284_v49 }
 0x109   : > { %v2004_v50 = vpop.f32.mrf.mxu0  ;;  %v2020_v51 = vpop.f32.mrf.mxu1 }
 0x10a   : > { %v1909_v52 = vpack.c.bf16 %v2004_v50, %v2004_v50  ;;  %675 = vst.msk [vmem:[#allocation2 + $0x10] sm:$0xff] %vm672_vm1, %v2004_v50  ;;  %v1925_v53 = vpack.c.bf16 %v2020_v51, %v2020_v51  ;;  %691 = vst.msk [vmem:[#allocation2 + $0x90] sm:$0xff] %vm672_vm1, %v2020_v51 }
 0x10b   : > { %v384_v54 = vpop.f32.mrf.mxu0  ;;  %v448_v55 = vpop.f32.mrf.mxu1 }
 0x10c   : > { %642 = vst.msk [vmem:[#allocation4 + $0x8] sm:$0xf] %vm639_vm2, %v1909_v52  ;;  %658 = vst.msk [vmem:[#allocation4 + $0x48] sm:$0xf] %vm639_vm2, %v1925_v53  ;;  %v1907_v56 = vpack.c.bf16 %v384_v54, %v384_v54  ;;  %v1923_v57 = vpack.c.bf16 %v448_v55, %v448_v55 }
 0x10d   : > { %673 = vst.msk [vmem:[#allocation2] sm:$0xff] %vm672_vm1, %v384_v54  ;;  %689 = vst.msk [vmem:[#allocation2 + $0x80] sm:$0xff] %vm672_vm1, %v448_v55  ;;  %v2005_v58 = vpop.f32.mrf.mxu0  ;;  %v2021_v59 = vpop.f32.mrf.mxu1 }
 0x10e   : > { %640 = vst.msk [vmem:[#allocation4] sm:$0xf] %vm639_vm2, %v1907_v56  ;;  %656 = vst.msk [vmem:[#allocation4 + $0x40] sm:$0xf] %vm639_vm2, %v1923_v57  ;;  %v1910_v60 = vpack.c.bf16 %v2005_v58, %v2005_v58  ;;  %v1926_v61 = vpack.c.bf16 %v2021_v59, %v2021_v59 }
 0x10f   : > { %676 = vst.msk [vmem:[#allocation2 + $0x18] sm:$0xff] %vm672_vm1, %v2005_v58  ;;  %692 = vst.msk [vmem:[#allocation2 + $0x98] sm:$0xff] %vm672_vm1, %v2021_v59  ;;  %v387_v62 = vpop.f32.mrf.mxu0  ;;  %v451_v63 = vpop.f32.mrf.mxu1 }
 0x110   : > { %643 = vst.msk [vmem:[#allocation4 + $0xc] sm:$0xf] %vm639_vm2, %v1910_v60  ;;  %659 = vst.msk [vmem:[#allocation4 + $0x4c] sm:$0xf] %vm639_vm2, %v1926_v61  ;;  %v1908_v0 = vpack.c.bf16 %v387_v62, %v387_v62  ;;  %v1924_v1 = vpack.c.bf16 %v451_v63, %v451_v63 }
 0x111   : > { %674 = vst.msk [vmem:[#allocation2 + $0x8] sm:$0xff] %vm672_vm1, %v387_v62  ;;  %690 = vst.msk [vmem:[#allocation2 + $0x88] sm:$0xff] %vm672_vm1, %v451_v63  ;;  %v2008_v2 = vpop.f32.mrf.mxu0  ;;  %v2024_v3 = vpop.f32.mrf.mxu1 }
 0x112   : > { %641 = vst.msk [vmem:[#allocation4 + $0x4] sm:$0xf] %vm639_vm2, %v1908_v0  ;;  %657 = vst.msk [vmem:[#allocation4 + $0x44] sm:$0xf] %vm639_vm2, %v1924_v1  ;;  %v1913_v4 = vpack.c.bf16 %v2008_v2, %v2008_v2  ;;  %v1929_v5 = vpack.c.bf16 %v2024_v3, %v2024_v3 }
 0x113   : > { %679 = vst.msk [vmem:[#allocation2 + $0x30] sm:$0xff] %vm672_vm1, %v2008_v2  ;;  %695 = vst.msk [vmem:[#allocation2 + $0xb0] sm:$0xff] %vm672_vm1, %v2024_v3  ;;  %v400_v6 = vpop.f32.mrf.mxu0  ;;  %v464_v7 = vpop.f32.mrf.mxu1 }
 0x114   : > { %646 = vst.msk [vmem:[#allocation4 + $0x18] sm:$0xf] %vm639_vm2, %v1913_v4  ;;  %662 = vst.msk [vmem:[#allocation4 + $0x58] sm:$0xf] %vm639_vm2, %v1929_v5  ;;  %v1911_v8 = vpack.c.bf16 %v400_v6, %v400_v6  ;;  %v1927_v9 = vpack.c.bf16 %v464_v7, %v464_v7 }
 0x115   : > { %677 = vst.msk [vmem:[#allocation2 + $0x20] sm:$0xff] %vm672_vm1, %v400_v6  ;;  %693 = vst.msk [vmem:[#allocation2 + $0xa0] sm:$0xff] %vm672_vm1, %v464_v7  ;;  %v2009_v13 = vpop.f32.mrf.mxu0  ;;  %v2025_v14 = vpop.f32.mrf.mxu1 }
 0x116   : > { %v707_v10 = vld [vmem:[#allocation2 + $0x10] ss:$2 sm:$0xff]  ;;  %v739_v11 = vld [vmem:[#allocation2 + $0x11] ss:$2 sm:$0xff]  ;;  %644 = vst.msk [vmem:[#allocation4 + $0x10] sm:$0xf] %vm639_vm2, %v1911_v8  ;;  %v1914_v17 = vpack.c.bf16 %v2009_v13, %v2009_v13  ;;  %v1930_v18 = vpack.c.bf16 %v2025_v14, %v2025_v14 }
 0x117   : > { %v723_v12 = vld [vmem:[#allocation2 + $0x90] ss:$2 sm:$0xff]  ;;  %v769_v15 = vmax.f32 %v707_v10, %v739_v11  ;;  %v755_v16 = vld [vmem:[#allocation2 + $0x91] ss:$2 sm:$0xff]  ;;  %660 = vst.msk [vmem:[#allocation4 + $0x50] sm:$0xf] %vm639_vm2, %v1927_v9  ;;  %v403_v23 = vpop.f32.mrf.mxu0  ;;  %v467_v24 = vpop.f32.mrf.mxu1 }
 0x118   : > { %680 = vst.msk [vmem:[#allocation2 + $0x38] sm:$0xff] %vm672_vm1, %v2009_v13  ;;  %696 = vst.msk [vmem:[#allocation2 + $0xb8] sm:$0xff] %vm672_vm1, %v2025_v14  ;;  %v777_v19 = vmax.f32 %v723_v12, %v755_v16  ;;  %v705_v20 = vld [vmem:[#allocation2] ss:$2 sm:$0xff]  ;;  %v737_v21 = vld [vmem:[#allocation2 + $0x1] ss:$2 sm:$0xff]  ;;  %v1912_v27 = vpack.c.bf16 %v403_v23, %v403_v23  ;;  %v1928_v28 = vpack.c.bf16 %v467_v24, %v467_v24 }
 0x119   : > { %v721_v22 = vld [vmem:[#allocation2 + $0x80] ss:$2 sm:$0xff]  ;;  %785 = vst.msk [vmem:[#allocation3 + $0x8] sm:$0xff] %vm672_vm1, %v769_v15  ;;  %v768_v25 = vmax.f32 %v705_v20, %v737_v21  ;;  %v753_v26 = vld [vmem:[#allocation2 + $0x81] ss:$2 sm:$0xff]  ;;  %678 = vst.msk [vmem:[#allocation2 + $0x28] sm:$0xff] %vm672_vm1, %v403_v23  ;;  %v2012_v30 = vpop.f32.mrf.mxu0  ;;  %v2028_v31 = vpop.f32.mrf.mxu1 }
 0x11a   : > { %647 = vst.msk [vmem:[#allocation4 + $0x1c] sm:$0xf] %vm639_vm2, %v1914_v17  ;;  %663 = vst.msk [vmem:[#allocation4 + $0x5c] sm:$0xf] %vm639_vm2, %v1930_v18  ;;  %v776_v29 = vmax.f32 %v721_v22, %v753_v26  ;;  %v1917_v32 = vpack.c.bf16 %v2012_v30, %v2012_v30  ;;  %v1933_v33 = vpack.c.bf16 %v2028_v31, %v2028_v31 }
 0x11b   : > { %694 = vst.msk [vmem:[#allocation2 + $0xa8] sm:$0xff] %vm672_vm1, %v467_v24  ;;  %793 = vst.msk [vmem:[#allocation3 + $0x48] sm:$0xff] %vm672_vm1, %v777_v19  ;;  %v416_v34 = vpop.f32.mrf.mxu0  ;;  %v480_v35 = vpop.f32.mrf.mxu1 }
 0x11c   : > { %784 = vst.msk [vmem:[#allocation3] sm:$0xff] %vm672_vm1, %v768_v25  ;;  %683 = vst.msk [vmem:[#allocation2 + $0x50] sm:$0xff] %vm672_vm1, %v2012_v30  ;;  %v1915_v36 = vpack.c.bf16 %v416_v34, %v416_v34  ;;  %v1931_v37 = vpack.c.bf16 %v480_v35, %v480_v35 }
 0x11d   : > { %645 = vst.msk [vmem:[#allocation4 + $0x14] sm:$0xf] %vm639_vm2, %v1912_v27  ;;  %661 = vst.msk [vmem:[#allocation4 + $0x54] sm:$0xf] %vm639_vm2, %v1928_v28  ;;  %v2013_v41 = vpop.f32.mrf.mxu0  ;;  %v2029_v42 = vpop.f32.mrf.mxu1 }
 0x11e   : > { %699 = vst.msk [vmem:[#allocation2 + $0xd0] sm:$0xff] %vm672_vm1, %v2028_v31  ;;  %792 = vst.msk [vmem:[#allocation3 + $0x40] sm:$0xff] %vm672_vm1, %v776_v29  ;;  %v1918_v45 = vpack.c.bf16 %v2013_v41, %v2013_v41  ;;  %v1934_v46 = vpack.c.bf16 %v2029_v42, %v2029_v42 }
 0x11f   : > { %650 = vst.msk [vmem:[#allocation4 + $0x28] sm:$0xf] %vm639_vm2, %v1917_v32  ;;  %666 = vst.msk [vmem:[#allocation4 + $0x68] sm:$0xf] %vm639_vm2, %v1933_v33  ;;  %v711_v38 = vld [vmem:[#allocation2 + $0x30] ss:$2 sm:$0xff]  ;;  %v419_v51 = vpop.f32.mrf.mxu0  ;;  %v483_v52 = vpop.f32.mrf.mxu1 }
 0x120   : > { %681 = vst.msk [vmem:[#allocation2 + $0x40] sm:$0xff] %vm672_vm1, %v416_v34  ;;  %697 = vst.msk [vmem:[#allocation2 + $0xc0] sm:$0xff] %vm672_vm1, %v480_v35  ;;  %v743_v39 = vld [vmem:[#allocation2 + $0x31] ss:$2 sm:$0xff]  ;;  %v727_v40 = vld [vmem:[#allocation2 + $0xb0] ss:$2 sm:$0xff]  ;;  %v1916_v55 = vpack.c.bf16 %v419_v51, %v419_v51  ;;  %v1932_v56 = vpack.c.bf16 %v483_v52, %v483_v52 }
 0x121   : > { %v771_v43 = vmax.f32 %v711_v38, %v743_v39  ;;  %v759_v44 = vld [vmem:[#allocation2 + $0xb1] ss:$2 sm:$0xff]  ;;  %648 = vst.msk [vmem:[#allocation4 + $0x20] sm:$0xf] %vm639_vm2, %v1915_v36  ;;  %664 = vst.msk [vmem:[#allocation4 + $0x60] sm:$0xf] %vm639_vm2, %v1931_v37  ;;  %v2016_v58 = vpop.f32.mrf.mxu0  ;;  %v2032_v59 = vpop.f32.mrf.mxu1 }
 0x122   : > { %684 = vst.msk [vmem:[#allocation2 + $0x58] sm:$0xff] %vm672_vm1, %v2013_v41  ;;  %700 = vst.msk [vmem:[#allocation2 + $0xd8] sm:$0xff] %vm672_vm1, %v2029_v42  ;;  %v779_v47 = vmax.f32 %v727_v40, %v759_v44  ;;  %v709_v48 = vld [vmem:[#allocation2 + $0x20] ss:$2 sm:$0xff]  ;;  %v741_v49 = vld [vmem:[#allocation2 + $0x21] ss:$2 sm:$0xff]  ;;  %v1921_v62 = vpack.c.bf16 %v2016_v58, %v2016_v58  ;;  %v1937_v63 = vpack.c.bf16 %v2032_v59, %v2032_v59 }
 0x123   : > { %v725_v50 = vld [vmem:[#allocation2 + $0xa0] ss:$2 sm:$0xff]  ;;  %787 = vst.msk [vmem:[#allocation3 + $0x18] sm:$0xff] %vm672_vm1, %v771_v43  ;;  %v770_v53 = vmax.f32 %v709_v48, %v741_v49  ;;  %v757_v54 = vld [vmem:[#allocation2 + $0xa1] ss:$2 sm:$0xff]  ;;  %682 = vst.msk [vmem:[#allocation2 + $0x48] sm:$0xff] %vm672_vm1, %v419_v51  ;;  %v432_v2 = vpop.f32.mrf.mxu0  ;;  %v496_v3 = vpop.f32.mrf.mxu1 }
 0x124   : > { %651 = vst.msk [vmem:[#allocation4 + $0x2c] sm:$0xf] %vm639_vm2, %v1918_v45  ;;  %667 = vst.msk [vmem:[#allocation4 + $0x6c] sm:$0xf] %vm639_vm2, %v1934_v46  ;;  %v778_v57 = vmax.f32 %v725_v50, %v757_v54  ;;  %v800_v60 = vld [vmem:[#allocation3] sm:$0xff]  ;;  %v809_v61 = vld [vmem:[#allocation3 + $0x8] sm:$0xff]  ;;  %v1919_v5 = vpack.c.bf16 %v432_v2, %v432_v2  ;;  %v1935_v6 = vpack.c.bf16 %v496_v3, %v496_v3 }
 0x125   : > { %698 = vst.msk [vmem:[#allocation2 + $0xc8] sm:$0xff] %vm672_vm1, %v483_v52  ;;  %795 = vst.msk [vmem:[#allocation3 + $0x58] sm:$0xff] %vm672_vm1, %v779_v47  ;;  %v817_v0 = vmax.f32 %v800_v60, %v809_v61  ;;  %v804_v1 = vld [vmem:[#allocation3 + $0x40] sm:$0xff]  ;;  %v813_v4 = vld [vmem:[#allocation3 + $0x48] sm:$0xff]  ;;  %v2017_v12 = vpop.f32.mrf.mxu0  ;;  %v2033_v13 = vpop.f32.mrf.mxu1 }
 0x126   : > { %786 = vst.msk [vmem:[#allocation3 + $0x10] sm:$0xff] %vm672_vm1, %v770_v53  ;;  %687 = vst.msk [vmem:[#allocation2 + $0x70] sm:$0xff] %vm672_vm1, %v2016_v58  ;;  %v821_v8 = vmax.f32 %v804_v1, %v813_v4  ;;  %v1922_v16 = vpack.c.bf16 %v2017_v12, %v2017_v12  ;;  %v1938_v17 = vpack.c.bf16 %v2033_v13, %v2033_v13 }
 0x127   : > { %649 = vst.msk [vmem:[#allocation4 + $0x24] sm:$0xf] %vm639_vm2, %v1916_v55  ;;  %665 = vst.msk [vmem:[#allocation4 + $0x64] sm:$0xf] %vm639_vm2, %v1932_v56  ;;  %v1939_v7 = vpack.c.bf16 %v817_v0, %v817_v0  ;;  %v435_v22 = vpop.f32.mrf.mxu0  ;;  %v499_v23 = vpop.f32.mrf.mxu1 }
 0x128   : > { %703 = vst.msk [vmem:[#allocation2 + $0xf0] sm:$0xff] %vm672_vm1, %v2032_v59  ;;  %794 = vst.msk [vmem:[#allocation3 + $0x50] sm:$0xff] %vm672_vm1, %v778_v57  ;;  %v1920_v26 = vpack.c.bf16 %v435_v22, %v435_v22  ;;  %v1936_v27 = vpack.c.bf16 %v499_v23, %v499_v23  ;;  %v1943_v28 = vpack.c.bf16 %v821_v8, %v821_v8 }
 0x129   : > { %654 = vst.msk [vmem:[#allocation4 + $0x38] sm:$0xf] %vm639_vm2, %v1921_v62  ;;  %670 = vst.msk [vmem:[#allocation4 + $0x78] sm:$0xf] %vm639_vm2, %v1937_v63  ;;  %v715_v9 = vld [vmem:[#allocation2 + $0x50] ss:$2 sm:$0xff]  ;;  %849 = vrot.lane.b32.xlu0 %v1939_v7, %s2460_s20 }
 0x12a   : > { %685 = vst.msk [vmem:[#allocation2 + $0x60] sm:$0xff] %vm672_vm1, %v432_v2  ;;  %701 = vst.msk [vmem:[#allocation2 + $0xe0] sm:$0xff] %vm672_vm1, %v496_v3  ;;  %v747_v10 = vld [vmem:[#allocation2 + $0x51] ss:$2 sm:$0xff]  ;;  %v731_v11 = vld [vmem:[#allocation2 + $0xd0] ss:$2 sm:$0xff] }
 0x12b   : > { %v773_v14 = vmax.f32 %v715_v9, %v747_v10  ;;  %v763_v15 = vld [vmem:[#allocation2 + $0xd1] ss:$2 sm:$0xff]  ;;  %652 = vst.msk [vmem:[#allocation4 + $0x30] sm:$0xf] %vm639_vm2, %v1919_v5  ;;  %668 = vst.msk [vmem:[#allocation4 + $0x70] sm:$0xf] %vm639_vm2, %v1935_v6 }
 0x12c   : > { %688 = vst.msk [vmem:[#allocation2 + $0x78] sm:$0xff] %vm672_vm1, %v2017_v12  ;;  %704 = vst.msk [vmem:[#allocation2 + $0xf8] sm:$0xff] %vm672_vm1, %v2033_v13  ;;  %v781_v18 = vmax.f32 %v731_v11, %v763_v15  ;;  %v713_v19 = vld [vmem:[#allocation2 + $0x40] ss:$2 sm:$0xff]  ;;  %v745_v20 = vld [vmem:[#allocation2 + $0x41] ss:$2 sm:$0xff] }
 0x12d   : > { %v729_v21 = vld [vmem:[#allocation2 + $0xc0] ss:$2 sm:$0xff]  ;;  %789 = vst.msk [vmem:[#allocation3 + $0x28] sm:$0xff] %vm672_vm1, %v773_v14  ;;  %v772_v24 = vmax.f32 %v713_v19, %v745_v20  ;;  %v761_v25 = vld [vmem:[#allocation2 + $0xc1] ss:$2 sm:$0xff]  ;;  %686 = vst.msk [vmem:[#allocation2 + $0x68] sm:$0xff] %vm672_vm1, %v435_v22  ;;  %857 = vrot.lane.b32.xlu0 %v1943_v28, %s2460_s20 }
 0x12e   : > { %655 = vst.msk [vmem:[#allocation4 + $0x3c] sm:$0xf] %vm639_vm2, %v1922_v16  ;;  %671 = vst.msk [vmem:[#allocation4 + $0x7c] sm:$0xf] %vm639_vm2, %v1938_v17  ;;  %v780_v29 = vmax.f32 %v729_v21, %v761_v25  ;;  %v814_v31 = vld [vmem:[#allocation3 + $0x58] sm:$0xff]  ;;  %v801_v32 = vld [vmem:[#allocation3 + $0x10] sm:$0xff] }
 0x12f   : > { %702 = vst.msk [vmem:[#allocation2 + $0xe8] sm:$0xff] %vm672_vm1, %v499_v23  ;;  %797 = vst.msk [vmem:[#allocation3 + $0x68] sm:$0xff] %vm672_vm1, %v781_v18  ;;  %v805_v30 = vld [vmem:[#allocation3 + $0x50] sm:$0xff]  ;;  %v810_v34 = vld [vmem:[#allocation3 + $0x18] sm:$0xff] }
 0x130   : > { %788 = vst.msk [vmem:[#allocation3 + $0x20] sm:$0xff] %vm672_vm1, %v772_v24  ;;  %796 = vst.msk [vmem:[#allocation3 + $0x60] sm:$0xff] %vm672_vm1, %v780_v29  ;;  %v822_v33 = vmax.f32 %v805_v30, %v814_v31  ;;  %v818_v39 = vmax.f32 %v801_v32, %v810_v34 }
 0x131   : > { %653 = vst.msk [vmem:[#allocation4 + $0x34] sm:$0xf] %vm639_vm2, %v1920_v26  ;;  %669 = vst.msk [vmem:[#allocation4 + $0x74] sm:$0xf] %vm639_vm2, %v1936_v27  ;;  %881 = vrot.lane.b32.xlu0 %v1939_v7, %s2461_s30 }
 0x132   : > { %v1944_v38 = vpack.c.bf16 %v822_v33, %v822_v33  ;;  %v1940_v49 = vpack.c.bf16 %v818_v39, %v818_v39 }
 0x133   : > { %v719_v35 = vld [vmem:[#allocation2 + $0x70] ss:$2 sm:$0xff]  ;;  %v751_v36 = vld [vmem:[#allocation2 + $0x71] ss:$2 sm:$0xff] }
 0x134   : > { %v735_v37 = vld [vmem:[#allocation2 + $0xf0] ss:$2 sm:$0xff]  ;;  %v775_v40 = vmax.f32 %v719_v35, %v751_v36  ;;  %v767_v41 = vld [vmem:[#allocation2 + $0xf1] ss:$2 sm:$0xff]  ;;  %v717_v43 = vld [vmem:[#allocation2 + $0x60] ss:$2 sm:$0xff]  ;;  %859 = vrot.lane.b32.xlu1 %v1944_v38, %s2460_s20 }
 0x135   : > { %v783_v42 = vmax.f32 %v735_v37, %v767_v41  ;;  %v749_v44 = vld [vmem:[#allocation2 + $0x61] ss:$2 sm:$0xff]  ;;  %889 = vrot.lane.b32.xlu0 %v1943_v28, %s2461_s30 }
 0x136   : > { %v733_v45 = vld [vmem:[#allocation2 + $0xe0] ss:$2 sm:$0xff]  ;;  %791 = vst.msk [vmem:[#allocation3 + $0x38] sm:$0xff] %vm672_vm1, %v775_v40  ;;  %v774_v46 = vmax.f32 %v717_v43, %v749_v44  ;;  %v765_v47 = vld [vmem:[#allocation2 + $0xe1] ss:$2 sm:$0xff] }
 0x137   : > { %799 = vst.msk [vmem:[#allocation3 + $0x78] sm:$0xff] %vm672_vm1, %v783_v42  ;;  %v782_v48 = vmax.f32 %v733_v45, %v765_v47  ;;  %v806_v50 = vld [vmem:[#allocation3 + $0x60] sm:$0xff]  ;;  %v815_v52 = vld [vmem:[#allocation3 + $0x68] sm:$0xff] }
 0x138   : > { %790 = vst.msk [vmem:[#allocation3 + $0x30] sm:$0xff] %vm672_vm1, %v774_v46  ;;  %v802_v51 = vld [vmem:[#allocation3 + $0x20] sm:$0xff]  ;;  %883 = vrot.lane.b32.xlu1 %v1940_v49, %s2461_s30  ;;  %v823_v53 = vmax.f32 %v806_v50, %v815_v52  ;;  %v811_v54 = vld [vmem:[#allocation3 + $0x28] sm:$0xff] }
 0x139   : > { %798 = vst.msk [vmem:[#allocation3 + $0x70] sm:$0xff] %vm672_vm1, %v782_v48  ;;  %v819_v55 = vmax.f32 %v802_v51, %v811_v54  ;;  %851 = vrot.lane.b32.xlu0 %v1940_v49, %s2460_s20 }
 0x13a   : > { %v1945_v56 = vpack.c.bf16 %v823_v53, %v823_v53 }
 0x13b   : > { %v1941_v57 = vpack.c.bf16 %v819_v55, %v819_v55 }
 0x13c   : > { %891 = vrot.lane.b32.xlu1 %v1944_v38, %s2461_s30 }
 0x13d   : > { %v812_v59 = vld [vmem:[#allocation3 + $0x38] sm:$0xff]  ;;  %861 = vrot.lane.b32.xlu0 %v1945_v56, %s2460_s20 }
 0x13e   : > { %v816_v63 = vld [vmem:[#allocation3 + $0x78] sm:$0xff] }
 0x13f   : > { %v803_v58 = vld [vmem:[#allocation3 + $0x30] sm:$0xff] }
 0x140   : > { %v820_v60 = vmax.f32 %v803_v58, %v812_v59  ;;  %v807_v61 = vld [vmem:[#allocation3 + $0x70] sm:$0xff]  ;;  %853 = vrot.lane.b32.xlu1 %v1941_v57, %s2460_s20 }
 0x141   : > { %v824_v0 = vmax.f32 %v807_v61, %v816_v63  ;;  %885 = vrot.lane.b32.xlu0 %v1941_v57, %s2461_s30 }
 0x142   : > { %v1942_v62 = vpack.c.bf16 %v820_v60, %v820_v60 }
 0x143   : > { %v1946_v1 = vpack.c.bf16 %v824_v0, %v824_v0 }
 0x144   : > { %855 = vrot.lane.b32.xlu1 %v1942_v62, %s2460_s20 }
 0x145   : > { %893 = vrot.lane.b32.xlu0 %v1945_v56, %s2461_s30 }
 0x148   : > { %863 = vrot.lane.b32.xlu1 %v1946_v1, %s2460_s20 }
 0x14c   : > { %887 = vrot.lane.b32.xlu1 %v1942_v62, %s2461_s30 }
 0x150   : > { %895 = vrot.lane.b32.xlu1 %v1946_v1, %s2461_s30 }
 0x19b   : > { %v850_v2 = vpop.permute.xlu0 %849 }
 0x19c   : > { %873 = vst.msk [vmem:[#allocation5] sm:$0xf] %vm639_vm2, %v850_v2 }
 0x19f   : > { %v858_v3 = vpop.permute.xlu0 %857 }
 0x1a0   : > { %877 = vst.msk [vmem:[#allocation5 + $0x10] sm:$0xf] %vm639_vm2, %v858_v3 }
 0x1a3   : > { %v882_v4 = vpop.permute.xlu0 %881 }
 0x1a4   : > { %906 = vst.msk [vmem:[#allocation6] sm:$0xf] %vm905_vm3, %v882_v4 }
 0x1a6   : > { %v860_v5 = vpop.permute.xlu1 %859 }
 0x1a7   : > { %878 = vst.msk [vmem:[#allocation5 + $0x14] sm:$0xf] %vm639_vm2, %v860_v5  ;;  %v890_v6 = vpop.permute.xlu0 %889 }
 0x1a8   : > { %910 = vst.msk [vmem:[#allocation6 + $0x10] sm:$0xf] %vm905_vm3, %v890_v6 }
 0x1aa   : > { %v884_v7 = vpop.permute.xlu1 %883 }
 0x1ab   : > { %907 = vst.msk [vmem:[#allocation6 + $0x4] sm:$0xf] %vm905_vm3, %v884_v7  ;;  %v852_v8 = vpop.permute.xlu0 %851 }
 0x1ac   : > { %874 = vst.msk [vmem:[#allocation5 + $0x4] sm:$0xf] %vm639_vm2, %v852_v8 }
 0x1ae   : > { %v892_v9 = vpop.permute.xlu1 %891 }
 0x1af   : > { %911 = vst.msk [vmem:[#allocation6 + $0x14] sm:$0xf] %vm905_vm3, %v892_v9  ;;  %v862_v10 = vpop.permute.xlu0 %861 }
 0x1b0   : > { %879 = vst.msk [vmem:[#allocation5 + $0x18] sm:$0xf] %vm639_vm2, %v862_v10 }
 0x1b2   : > { %v854_v11 = vpop.permute.xlu1 %853 }
 0x1b3   : > { %875 = vst.msk [vmem:[#allocation5 + $0x8] sm:$0xf] %vm639_vm2, %v854_v11  ;;  %v886_v12 = vpop.permute.xlu0 %885 }
 0x1b4   : > { %908 = vst.msk [vmem:[#allocation6 + $0x8] sm:$0xf] %vm905_vm3, %v886_v12 }
 0x1b6   : > { %v856_v13 = vpop.permute.xlu1 %855 }
 0x1b7   : > { %876 = vst.msk [vmem:[#allocation5 + $0xc] sm:$0xf] %vm639_vm2, %v856_v13  ;;  %v894_v14 = vpop.permute.xlu0 %893 }
 0x1b8   : > { %912 = vst.msk [vmem:[#allocation6 + $0x18] sm:$0xf] %vm905_vm3, %v894_v14 }
 0x1ba   : > { %v864_v15 = vpop.permute.xlu1 %863 }
 0x1bb   : > { %880 = vst.msk [vmem:[#allocation5 + $0x1c] sm:$0xf] %vm639_vm2, %v864_v15 }
 0x1be   : > { %v888_v16 = vpop.permute.xlu1 %887 }
 0x1bf   : > { %909 = vst.msk [vmem:[#allocation6 + $0xc] sm:$0xf] %vm905_vm3, %v888_v16 }
 0x1c2   : > { %v896_v17 = vpop.permute.xlu1 %895 }
 0x1c3   : > { %913 = vst.msk [vmem:[#allocation6 + $0x1c] sm:$0xf] %vm905_vm3, %v896_v17 }
 0x1c4 PF: > { %v2226_v18 = vld [vmem:[#allocation5 + $0x18] sm:$0xff]   ;;  %vm1003_vm4 = vcmask 31744   ;;  %v2227_v19 = vld [vmem:[#allocation5 + $0x10] sm:$0xff]   ;;  %s1857_s6 = sshll.u32 %s2439_s23, 7  ;;  %v2228_v23 = vld [vmem:[#allocation5 + $0x8] sm:$0xff]   ;;  %vm1137_vm5 = vcmask 523264  }
 0x1c5   : > { %2112 = vmatprep.subr.msk.bf16.mxu0 %vm1003_vm4, %v2226_v18  ;;  %v1038_v20 = vsel %vm1003_vm4, %v2226_v18, 0  ;;  %s915_s25 = sshra.s32 %s1857_s6, 3  ;;  %v1035_v22 = vsel %vm1003_vm4, %v2227_v19, 0  ;;  %v1032_v24 = vsel %vm1003_vm4, %v2228_v23, 0  ;;  %v2229_v25 = vld [vmem:[#allocation5] sm:$0xff]   ;;  %v2239_v59 = vld [vmem:[#allocation6 + $0x10] sm:$0xff]   ;;  %s2927_s9 = scalar_lea.vmem %s2612_s10, %s1857_s6 [#allocation8] }
 0x1c6   : > { %2035 = vmatpush3.bf16.xpose.msra.mxu0 %v1038_v20  ;;  %s1858_s16 = sshll.u32 %s915_s25, 2  ;;  %v1029_v26 = vsel %vm1003_vm4, %v2229_v25, 0  ;;  %v2240_v0 = vld [vmem:[#allocation6 + $0x8] sm:$0xff]   ;;  %v2241_v4 = vld [vmem:[#allocation6] sm:$0xff]   ;;  %vm1491_vm6 = vcmask 130048   ;;  %s1630_s8 = sld [smem:[#allocation7]] }
 0x1c7   : > { %2113 = vmatprep.subr.msk.bf16.mxu0 %vm1003_vm4, %v2227_v19  ;;  %s918_s27 = scalar_lea.vmem [#allocation4], %s1858_s16  ;;  %vm1664_vm7 = vcmask 261120   ;;  %s1901_s10 = sshll.u32 %s2439_s23, 4 }
 0x1c8   : > { %v2230_v21 = vld [vmem:[%s918_s27] sm:$0xff]   ;;  %v2231_v27 = vld [vmem:[%s918_s27 + $0x8] sm:$0xff]   ;;  %v2232_v28 = vld [vmem:[%s918_s27 + $0x10] sm:$0xff]   ;;  %s1902_s7 = sshll.u32 %s2443_s24, 5  ;;  %s1697_s24 = sshll.u32 %s2621_s11, 4  ;;  %s2999_s24 = int_to_ptr.vmem [resolvable:$true] %s1697_s24 }
 0x1c9   : > { %2042 = vmatprep.mubr.msk.bf16.mxu0 %vm1003_vm4, %v2230_v21  ;;  %v2233_v29 = vld [vmem:[%s918_s27 + $0x18] sm:$0xff]   ;;  %v2234_v30 = vld [vmem:[%s918_s27 + $0x20] sm:$0xff]   ;;  %v2235_v31 = vld [vmem:[%s918_s27 + $0x28] sm:$0xff]   ;;  %s1694_s20 = sadd.s32 %s1902_s7, %s1901_s10  ;;  %s3007_s16 = scalar_lea.sflag [#allocation10], %s228_s5 }
 0x1ca   : > { %v2236_v32 = vld [vmem:[%s918_s27 + $0x30] sm:$0xff]   ;;  %v2237_v33 = vld [vmem:[%s918_s27 + $0x38] sm:$0xff]   ;;  %s1903_s23 = sshll.u32 %s1694_s20, 7  ;;  %s2335_s27 = scalar_lea.vmem %s2999_s24, 2048 }
 0x1cb   : > { %v2238_v34 = vld [vmem:[#allocation6 + $0x18] sm:$0xff]   ;;  %s2997_s25 = scalar_lea.hbm %s3071_s4, %s1903_s23  ;;  %p2336_p7 = scmp.ne.s32.totalorder %s2999_s24, %s2335_s27 }
 0x1cc   : > { %2104 = vmatprep.subr.bf16.mxu1 %v2238_v34  ;;  %s2462_s29 = smov [#allocation11]  }
 0x1cd   : > { %2108 = vmatpush3.bf16.msra.mxu1 %v2238_v34  ;;  %p2337_p5 = pnand %p2336_p7, %p2575_p12  ;;  %s2339_s28 = sshll.u32 %s2462_s29, 4  ;;  %s2340_s28 = int_to_ptr.vmem [resolvable:$false] %s2339_s28 }
 0x1ce   : > { %2037 = vmatpush3.bf16.xpose.msra.mxu0 %v1035_v22  ;;  %2105 = vmatprep.subr.bf16.mxu1 %v2239_v59  ;;  %p2342_p9 = scmp.lt.s32.totalorder %s2999_s24, %s2340_s28 }
 0x1cf   : > { %2114 = vmatprep.subr.msk.bf16.mxu0 %vm1003_vm4, %v2228_v23  ;;  %p2338_p8 = pneg %p2337_p5 }
 0x1d1   : > { %2109 = vmatpush3.bf16.msra.mxu1 %v2239_v59 }
 0x1d2   : > { %2106 = vmatprep.subr.bf16.mxu1 %v2240_v0 }
 0x1d5   : > { %2110 = vmatpush3.bf16.msra.mxu1 %v2240_v0 }
 0x1d6   : > { %2039 = vmatpush3.bf16.xpose.msra.mxu0 %v1032_v24  ;;  %2107 = vmatprep.subr.bf16.mxu1 %v2241_v4 }
 0x1d7   : > { %2115 = vmatprep.subr.msk.bf16.mxu0 %vm1003_vm4, %v2229_v25 }
 0x1d9   : > { %2111 = vmatpush3.bf16.msra.mxu1 %v2241_v4 }
 0x1de   : > { %2041 = vmatpush3.bf16.xpose.msra.mxu0 %v1029_v26 }
 0x1df   : > { %2058 = vmatprep.subr.bf16.mxu0 %v2238_v34 }
 0x1e5   : > { %2043 = vmatmul.mubr.msk.bf16.vlgmr.msra.gmra.mxu0 %vm1003_vm4, %v2231_v27 }
 0x1e6   : > { %2046 = vmatprep.mubr.msk.bf16.mxu0 %vm1003_vm4, %v2232_v28  ;;  %2059 = vmatpush3.bf16.msra.mxu0 %v2238_v34 }
 0x1e7   : > { %2060 = vmatprep.subr.bf16.mxu0 %v2239_v59 }
 0x1ea   : > { %2061 = vmatpush3.bf16.msra.mxu0 %v2239_v59 }
 0x1eb   : > { %2062 = vmatprep.subr.bf16.mxu0 %v2240_v0 }
 0x1ed   : > { %2047 = vmatmul.mubr.msk.bf16.gmra.mxu0 %vm1003_vm4, %v2233_v29 }
 0x1ee   : > { %2050 = vmatprep.mubr.msk.bf16.mxu0 %vm1003_vm4, %v2234_v30  ;;  %2063 = vmatpush3.bf16.msra.mxu0 %v2240_v0 }
 0x1ef   : > { %2064 = vmatprep.subr.bf16.mxu0 %v2241_v4 }
 0x1f2   : > { %2065 = vmatpush3.bf16.msra.mxu0 %v2241_v4 }
 0x1f5   : > { %2051 = vmatmul.mubr.msk.bf16.gmra.mxu0 %vm1003_vm4, %v2235_v31 }
 0x1f6   : > { %2054 = vmatprep.mubr.msk.bf16.mxu0 %vm1003_vm4, %v2236_v32 }
 0x1fd   : > { %2055 = vmatmul.mubr.msk.bf16.gmra.mxu0 %vm1003_vm4, %v2237_v33 }
 0x2a5   : > { %v2809_v35 = vpop.f32.mrf.mxu0 }
 0x2a6   : > { %v1144_v36 = vsel %vm1137_vm5, %v2809_v35, -inf }
 0x2a7   : > { %1145 = vmax.xlane.f32.xlu1 %v1144_v36  ;;  %v2813_v37 = vpop.f32.mrf.mxu0 }
 0x2a8   : > { %v1138_v38 = vsel %vm1137_vm5, %v2813_v37, -inf }
 0x2a9   : > { %1139 = vmax.xlane.f32.xlu0 %v1138_v38  ;;  %v2817_v39 = vpop.f32.mrf.mxu0 }
 0x2aa   : > { %v1147_v40 = vsel %vm1137_vm5, %v2817_v39, -inf }
 0x2ab   : > { %1148 = vmax.xlane.f32.xlu1 %v1147_v40  ;;  %v2821_v41 = vpop.f32.mrf.mxu0 }
 0x2ac   : > { %v1141_v42 = vsel %vm1137_vm5, %v2821_v41, -inf }
 0x2ad   : > { %1142 = vmax.xlane.f32.xlu0 %v1141_v42  ;;  %v2825_v43 = vpop.f32.mrf.mxu0 }
 0x2ae   : > { %v1156_v48 = vsel %vm1137_vm5, %v2825_v43, -inf }
 0x2af   : > { %v2827_v44 = vpop.f32.mrf.mxu0 }
 0x2b0   : > { %v1150_v45 = vsel %vm1137_vm5, %v2827_v44, -inf }
 0x2b1   : > { %1151 = vmax.xlane.f32.xlu0 %v1150_v45  ;;  %v2831_v46 = vpop.f32.mrf.mxu0 }
 0x2b2   : > { %v1159_v52 = vsel %vm1137_vm5, %v2831_v46, -inf }
 0x2b3   : > { %v2833_v47 = vpop.f32.mrf.mxu0 }
 0x2b4   : > { %v1153_v49 = vsel %vm1137_vm5, %v2833_v47, -inf }
 0x2b5   : > { %1157 = vmax.xlane.f32.xlu0 %v1156_v48  ;;  %1154 = vmax.xlane.f32.xlu1 %v1153_v49  ;;  %v2839_v50 = vpop.f32.mrf.mxu0 }
 0x2b6   : > { %v1168_v56 = vsel %vm1137_vm5, %v2839_v50, -inf }
 0x2b7   : > { %v2841_v51 = vpop.f32.mrf.mxu0 }
 0x2b8   : > { %v1162_v53 = vsel %vm1137_vm5, %v2841_v51, -inf }
 0x2b9   : > { %1160 = vmax.xlane.f32.xlu1 %v1159_v52  ;;  %1163 = vmax.xlane.f32.xlu0 %v1162_v53  ;;  %v2847_v54 = vpop.f32.mrf.mxu0 }
 0x2ba   : > { %v1171_v61 = vsel %vm1137_vm5, %v2847_v54, -inf }
 0x2bb   : > { %v2849_v55 = vpop.f32.mrf.mxu0 }
 0x2bc   : > { %v1165_v57 = vsel %vm1137_vm5, %v2849_v55, -inf }
 0x2bd   : > { %1169 = vmax.xlane.f32.xlu0 %v1168_v56  ;;  %1166 = vmax.xlane.f32.xlu1 %v1165_v57  ;;  %v2855_v58 = vpop.f32.mrf.mxu0 }
 0x2be   : > { %v1180_v2 = vsel %vm1137_vm5, %v2855_v58, -inf }
 0x2bf   : > { %v2857_v60 = vpop.f32.mrf.mxu0 }
 0x2c0   : > { %v1174_v62 = vsel %vm1137_vm5, %v2857_v60, -inf }
 0x2c1   : > { %1172 = vmax.xlane.f32.xlu1 %v1171_v61  ;;  %1175 = vmax.xlane.f32.xlu0 %v1174_v62  ;;  %v2863_v63 = vpop.f32.mrf.mxu0 }
 0x2c2   : > { %v1183_v5 = vsel %vm1137_vm5, %v2863_v63, -inf }
 0x2c3   : > { %v2865_v1 = vpop.f32.mrf.mxu0 }
 0x2c4   : > { %v1177_v3 = vsel %vm1137_vm5, %v2865_v1, -inf }
 0x2c5   : > { %1181 = vmax.xlane.f32.xlu0 %v1180_v2  ;;  %1178 = vmax.xlane.f32.xlu1 %v1177_v3 }
 0x2c9   : > { %1184 = vmax.xlane.f32.xlu1 %v1183_v5 }
 0x330   : > { %v1146_v6 = vpop.xlane.xlu1 %1145 }
 0x331   : > { %v1188_v7 = vsub.f32 %v2809_v35, %v1146_v6 }
 0x332   : > { %v1140_v8 = vpop.xlane.xlu0 %1139 }
 0x333   : > { %v1186_v9 = vsub.f32 %v2813_v37, %v1140_v8  ;;  %v1206_v10 = vmul.f32 1.442695, %v1188_v7 }
 0x334   : > { %v1149_v11 = vpop.xlane.xlu1 %1148 }
 0x335   : > { %v1202_v12 = vmul.f32 1.442695, %v1186_v9  ;;  %v1189_v13 = vsub.f32 %v2817_v39, %v1149_v11 }
 0x336   : > { %v1143_v14 = vpop.xlane.xlu0 %1142 }
 0x337   : > { %2243 = vpow2.f32 %v1202_v12  ;;  %v1208_v15 = vmul.f32 1.442695, %v1189_v13  ;;  %v1187_v16 = vsub.f32 %v2821_v41, %v1143_v14 }
 0x338   : > { %2245 = vpow2.f32 %v1206_v10 }
 0x339   : > { %v1204_v17 = vmul.f32 1.442695, %v1187_v16  ;;  %2247 = vpow2.f32 %v1208_v15 }
 0x33a   : > { %v1152_v18 = vpop.xlane.xlu0 %1151 }
 0x33b   : > { %2249 = vpow2.f32 %v1204_v17  ;;  %v1190_v19 = vsub.f32 %v2827_v44, %v1152_v18 }
 0x33d   : > { %v1210_v20 = vmul.f32 1.442695, %v1190_v19 }
 0x33e   : > { %v1158_v21 = vpop.xlane.xlu0 %1157  ;;  %v1155_v22 = vpop.xlane.xlu1 %1154 }
 0x33f   : > { %2251 = vpow2.f32 %v1210_v20  ;;  %v1192_v23 = vsub.f32 %v2825_v43, %v1158_v21  ;;  %v1191_v24 = vsub.f32 %v2833_v47, %v1155_v22 }
 0x341   : > { %v1214_v25 = vmul.f32 1.442695, %v1192_v23  ;;  %v1212_v26 = vmul.f32 1.442695, %v1191_v24 }
 0x342   : > { %v1161_v27 = vpop.xlane.xlu1 %1160  ;;  %v1164_v28 = vpop.xlane.xlu0 %1163 }
 0x343   : > { %2253 = vpow2.f32 %v1214_v25  ;;  %v1193_v29 = vsub.f32 %v2831_v46, %v1161_v27  ;;  %v1194_v30 = vsub.f32 %v2841_v51, %v1164_v28 }
 0x344   : > { %v2244_v31 = vpop.eup %2243  ;;  %2255 = vpow2.f32 %v1212_v26 }
 0x345   : > { %v2246_v32 = vpop.eup %2245  ;;  %v1216_v33 = vmul.f32 1.442695, %v1193_v29  ;;  %v1218_v34 = vmul.f32 1.442695, %v1194_v30  ;;  %v1234_v35 = vsel %vm1137_vm5, %v2244_v31, 0.0  ;;  %v2242_v30 = vld [vmem:[%s3070_s3] sm:$0xff]  }
 0x346   : > { %v1170_v36 = vpop.xlane.xlu0 %1169  ;;  %v1167_v37 = vpop.xlane.xlu1 %1166  ;;  %1235 = vadd.xlane.f32.xlu0 %v1234_v35  ;;  %v1240_v42 = vsel %vm1137_vm5, %v2246_v32, 0.0  ;;  %2082 = vmatprep.subr.bf16.mxu1 %v2242_v30 }
 0x347   : > { %v2248_v38 = vpop.eup %2247  ;;  %2257 = vpow2.f32 %v1216_v33  ;;  %v1196_v39 = vsub.f32 %v2839_v50, %v1170_v36  ;;  %v1195_v40 = vsub.f32 %v2849_v55, %v1167_v37 }
 0x348   : > { %v2250_v41 = vpop.eup %2249  ;;  %2259 = vpow2.f32 %v1218_v34  ;;  %v1283_v47 = vpack.c.bf16 %v2248_v38, %v2246_v32  ;;  %v1243_v57 = vsel %vm1137_vm5, %v2248_v38, 0.0 }
 0x349   : > { %v1222_v43 = vmul.f32 1.442695, %v1196_v39  ;;  %v1220_v44 = vmul.f32 1.442695, %v1195_v40  ;;  %v1237_v45 = vsel %vm1137_vm5, %v2250_v41, 0.0  ;;  %v1282_v46 = vpack.c.bf16 %v2250_v41, %v2244_v31 }
 0x34a   : > { %v1173_v48 = vpop.xlane.xlu1 %1172  ;;  %1241 = vadd.xlane.f32.xlu0 %v1240_v42  ;;  %v1176_v49 = vpop.xlane.xlu0 %1175  ;;  %1238 = vadd.xlane.f32.xlu1 %v1237_v45 }
 0x34b   : > { %2261 = vpow2.f32 %v1222_v43  ;;  %v1197_v51 = vsub.f32 %v2847_v54, %v1173_v48  ;;  %v1198_v50 = vsub.f32 %v2857_v60, %v1176_v49  ;;  %2066 = vmatprep.mubr.msk.bf16.mxu0 %vm1137_vm5, %v1282_v46 }
 0x34c   : > { %v2252_v52 = vpop.eup %2251  ;;  %2263 = vpow2.f32 %v1220_v44  ;;  %2067 = vmatmul.mubr.msk.bf16.vlgmr.msra.gmra.mxu0 %vm1137_vm5, %v1283_v47 }
 0x34d   : > { %v1224_v53 = vmul.f32 1.442695, %v1197_v51  ;;  %v1226_v55 = vmul.f32 1.442695, %v1198_v50  ;;  %v1246_v56 = vsel %vm1137_vm5, %v2252_v52, 0.0 }
 0x34e   : > { %1247 = vadd.xlane.f32.xlu0 %v1246_v56  ;;  %v1182_v59 = vpop.xlane.xlu0 %1181  ;;  %1244 = vadd.xlane.f32.xlu1 %v1243_v57  ;;  %v1179_v61 = vpop.xlane.xlu1 %1178 }
 0x34f   : > { %2265 = vpow2.f32 %v1224_v53  ;;  %v1200_v54 = vsub.f32 %v2855_v58, %v1182_v59  ;;  %v1199_v60 = vsub.f32 %v2865_v1, %v1179_v61 }
 0x350   : > { %v2254_v62 = vpop.eup %2253  ;;  %2267 = vpow2.f32 %v1226_v55 }
 0x351   : > { %v2256_v0 = vpop.eup %2255  ;;  %v1230_v2 = vmul.f32 1.442695, %v1200_v54  ;;  %v1228_v3 = vmul.f32 1.442695, %v1199_v60  ;;  %v1252_v4 = vsel %vm1137_vm5, %v2254_v62, 0.0 }
 0x352   : > { %1253 = vadd.xlane.f32.xlu0 %v1252_v4  ;;  %v1249_v5 = vsel %vm1137_vm5, %v2256_v0, 0.0  ;;  %v1185_v6 = vpop.xlane.xlu1 %1184  ;;  %v1284_v7 = vpack.c.bf16 %v2256_v0, %v2252_v52 }
 0x353   : > { %2269 = vpow2.f32 %v1230_v2  ;;  %1250 = vadd.xlane.f32.xlu1 %v1249_v5  ;;  %v1201_v8 = vsub.f32 %v2863_v63, %v1185_v6 }
 0x354   : > { %v2258_v9 = vpop.eup %2257  ;;  %2271 = vpow2.f32 %v1228_v3  ;;  %2070 = vmatprep.mubr.msk.bf16.mxu1 %vm1137_vm5, %v1284_v7 }
 0x355   : > { %v2260_v58 = vpop.eup %2259  ;;  %v1232_v1 = vmul.f32 1.442695, %v1201_v8  ;;  %v1255_v10 = vsel %vm1137_vm5, %v2258_v9, 0.0  ;;  %v1285_v11 = vpack.c.bf16 %v2258_v9, %v2254_v62 }
 0x356   : > { %v1258_v12 = vsel %vm1137_vm5, %v2260_v58, 0.0 }
 0x357   : > { %2273 = vpow2.f32 %v1232_v1  ;;  %1259 = vadd.xlane.f32.xlu0 %v1258_v12  ;;  %1256 = vadd.xlane.f32.xlu1 %v1255_v10 }
 0x358   : > { %v2262_v13 = vpop.eup %2261  ;;  %2071 = vmatmul.mubr.msk.bf16.vlgmr.msra.gmra.mxu1 %vm1137_vm5, %v1285_v11 }
 0x359   : > { %v2264_v14 = vpop.eup %2263  ;;  %v1264_v63 = vsel %vm1137_vm5, %v2262_v13, 0.0  ;;  %2083 = vmatpush3.bf16.msra.mxu1 %v2242_v30 }
 0x35a   : > { %v1261_v15 = vsel %vm1137_vm5, %v2264_v14, 0.0  ;;  %v1286_v16 = vpack.c.bf16 %v2264_v14, %v2260_v58 }
 0x35b   : > { %1265 = vadd.xlane.f32.xlu0 %v1264_v63  ;;  %1262 = vadd.xlane.f32.xlu1 %v1261_v15 }
 0x35c   : > { %v2266_v17 = vpop.eup %2265  ;;  %2074 = vmatprep.mubr.msk.bf16.mxu1 %vm1137_vm5, %v1286_v16 }
 0x35d   : > { %v2268_v18 = vpop.eup %2267  ;;  %v1267_v19 = vsel %vm1137_vm5, %v2266_v17, 0.0  ;;  %v1287_v20 = vpack.c.bf16 %v2266_v17, %v2262_v13 }
 0x35e   : > { %v1270_v21 = vsel %vm1137_vm5, %v2268_v18, 0.0 }
 0x35f   : > { %1271 = vadd.xlane.f32.xlu0 %v1270_v21  ;;  %1268 = vadd.xlane.f32.xlu1 %v1267_v19 }
 0x360   : > { %v2270_v22 = vpop.eup %2269  ;;  %2075 = vmatmul.mubr.msk.bf16.gmra.mxu1 %vm1137_vm5, %v1287_v20 }
 0x361   : > { %v2272_v23 = vpop.eup %2271  ;;  %v1276_v24 = vsel %vm1137_vm5, %v2270_v22, 0.0 }
 0x362   : > { %v1273_v25 = vsel %vm1137_vm5, %v2272_v23, 0.0  ;;  %v1288_v26 = vpack.c.bf16 %v2272_v23, %v2268_v18 }
 0x363   : > { %1277 = vadd.xlane.f32.xlu0 %v1276_v24  ;;  %1274 = vadd.xlane.f32.xlu1 %v1273_v25 }
 0x364   : > { %v2274_v27 = vpop.eup %2273  ;;  %2078 = vmatprep.mubr.msk.bf16.mxu1 %vm1137_vm5, %v1288_v26 }
 0x365   : > { %v1279_v28 = vsel %vm1137_vm5, %v2274_v27, 0.0  ;;  %v1289_v29 = vpack.c.bf16 %v2274_v27, %v2270_v22 }
 0x367   : > { %1280 = vadd.xlane.f32.xlu1 %v1279_v28 }
 0x368   : > { %2079 = vmatmul.mubr.msk.bf16.gmra.mxu1 %vm1137_vm5, %v1289_v29 }
 0x3cf   : > { %v1236_v32 = vpop.xlane.xlu0 %1235 }
 0x3d0   : > { %2275 = vrcp.f32 %v1236_v32 }
 0x3d3   : > { %v1239_v31 = vpop.xlane.xlu1 %1238  ;;  %v1242_v34 = vpop.xlane.xlu0 %1241 }
 0x3d7   : > { %v1245_v33 = vpop.xlane.xlu1 %1244  ;;  %v1248_v36 = vpop.xlane.xlu0 %1247 }
 0x3d8   : > { %2277 = vrcp.f32 %v1245_v33 }
 0x3d9   : > { %2279 = vrcp.f32 %v1239_v31 }
 0x3da   : > { %2281 = vrcp.f32 %v1242_v34 }
 0x3db   : > { %v1254_v38 = vpop.xlane.xlu0 %1253  ;;  %2283 = vrcp.f32 %v1248_v36 }
 0x3dc   : > { %v1251_v35 = vpop.xlane.xlu1 %1250 }
 0x3dd   : > { %v2276_v43 = vpop.eup %2275 }
 0x3e0   : > { %v1257_v37 = vpop.xlane.xlu1 %1256  ;;  %v1260_v41 = vpop.xlane.xlu0 %1259 }
 0x3e1   : > { %2285 = vrcp.f32 %v1257_v37 }
 0x3e2   : > { %2287 = vrcp.f32 %v1251_v35 }
 0x3e3   : > { %2289 = vrcp.f32 %v1254_v38 }
 0x3e4   : > { %v1263_v39 = vpop.xlane.xlu1 %1262  ;;  %v1266_v50 = vpop.xlane.xlu0 %1265  ;;  %2291 = vrcp.f32 %v1260_v41  ;;  %v1616_v41 = vld [vmem:[%s2927_s9 + $0x10] sm:$0xff] }
 0x3e5   : > { %v2278_v45 = vpop.eup %2277 }
 0x3e6   : > { %v2280_v47 = vpop.eup %2279 }
 0x3e7   : > { %v2282_v51 = vpop.eup %2281 }
 0x3e8   : > { %v1269_v46 = vpop.xlane.xlu1 %1268  ;;  %v1272_v54 = vpop.xlane.xlu0 %1271 }
 0x3e9   : > { %2293 = vrcp.f32 %v1269_v46  ;;  %v2284_v62 = vpop.eup %2283 }
 0x3ea   : > { %2295 = vrcp.f32 %v1263_v39  ;;  %v2929_v39 = vstv %s1630_s8  ;;  %s2341_s8 = scalar_lea.vmem %s2340_s28, 4096 }
 0x3eb   : > { %2297 = vrcp.f32 %v1266_v50  ;;  %p2343_p10 = scmp.lt.s32.totalorder %s2341_s8, %s2335_s27 }
 0x3ec   : > { %v1275_v59 = vpop.xlane.xlu1 %1274  ;;  %2299 = vrcp.f32 %v1272_v54  ;;  %v1278_v8 = vpop.xlane.xlu0 %1277 }
 0x3ed   : > { %p2344_p11 = por %p2343_p10, %p2342_p9 }
 0x3ee   : > { %v2286_v2 = vpop.eup %2285 }
 0x3ef   : > { %v2288_v4 = vpop.eup %2287  ;;  %p2345_p13 = pnand %p2344_p11, %p2338_p8 }
 0x3f0   : > { %v1281_v3 = vpop.xlane.xlu1 %1280  ;;  %v2290_v7 = vpop.eup %2289 }
 0x3f1   : > { %2301 = vrcp.f32 %v1281_v3  ;;  %v2292_v14 = vpop.eup %2291  ;;  %v1621_v3 = vld [vmem:[%s2927_s9 + $0x38] sm:$0xff] }
 0x3f2   : > { %2303 = vrcp.f32 %v1275_v59  ;;  %v1620_v59 = vld [vmem:[%s2927_s9 + $0x30] sm:$0xff] }
 0x3f3   : > { %2305 = vrcp.f32 %v1278_v8 }
 0x3f6   : > { %v2294_v15 = vpop.eup %2293 }
 0x3f7   : > { %v2296_v16 = vpop.eup %2295 }
 0x3f8   : > { %v2298_v19 = vpop.eup %2297 }
 0x3f9   : > { %v2300_v27 = vpop.eup %2299 }
 0x3fe   : > { %v2302_v29 = vpop.eup %2301 }
 0x3ff   : > { %v2304_v30 = vpop.eup %2303 }
 0x400   : > { %v2306_v33 = vpop.eup %2305 }
 0x40c   : > { %v2068_v40 = vpop.f32.mrf.mxu0 }
 0x40d   : > { %v1461_v55 = vmul.f32 %v2282_v51, %v2068_v40 }
 0x40e   : > { %v1380_v42 = vpop.f32.mrf.mxu0 }
 0x40f   : > { %v1459_v52 = vmul.f32 %v2276_v43, %v1380_v42 }
 0x410   : > { %v2069_v44 = vpop.f32.mrf.mxu0 }
 0x411   : > { %v1462_v48 = vmul.f32 %v2278_v45, %v2069_v44  ;;  %v1614_v44 = vld [vmem:[%s2927_s9] sm:$0xff] }
 0x412   : > { %v1383_v49 = vpop.f32.mrf.mxu0 }
 0x413   : > { %v1460_v53 = vmul.f32 %v2280_v47, %v1383_v49  ;;  %v1476_v57 = vpack.c.bf16 %v1462_v48, %v1461_v55  ;;  %v1617_v48 = vld [vmem:[%s2927_s9 + $0x18] sm:$0xff] }
 0x415   : > { %v1475_v56 = vpack.c.bf16 %v1460_v53, %v1459_v52  ;;  %v1615_v52 = vld [vmem:[%s2927_s9 + $0x8] sm:$0xff] }
 0x417   : > { %2084 = vmatprep.mubr.msk.bf16.mxu1 %vm1491_vm6, %v1475_v56 }
 0x418   : > { %v2072_v61 = vpop.f32.mrf.mxu1  ;;  %2085 = vmatmul.mubr.msk.bf16.vlgmr.msra.gmra.mxu1 %vm1491_vm6, %v1476_v57 }
 0x419   : > { %v1465_v1 = vmul.f32 %v2290_v7, %v2072_v61  ;;  %v1619_v7 = vld [vmem:[%s2927_s9 + $0x28] sm:$0xff] }
 0x41a   : > { %v1396_v60 = vpop.f32.mrf.mxu1 }
 0x41b   : > { %v1463_v9 = vmul.f32 %v2284_v62, %v1396_v60  ;;  %v1618_v60 = vld [vmem:[%s2927_s9 + $0x20] sm:$0xff] }
 0x41c   : > { %v2073_v0 = vpop.f32.mrf.mxu1 }
 0x41d   : > { %v1466_v5 = vmul.f32 %v2286_v2, %v2073_v0 }
 0x41e   : > { %v1399_v6 = vpop.f32.mrf.mxu1 }
 0x41f   : > { %v1464_v58 = vmul.f32 %v2288_v4, %v1399_v6  ;;  %v1478_v12 = vpack.c.bf16 %v1466_v5, %v1465_v1  ;;  %v1624_v1 = vld [vmem:[%s2927_s9 + $0x50] sm:$0xff] }
 0x420   : > { %v2076_v10 = vpop.f32.mrf.mxu1 }
 0x421   : > { %v1477_v11 = vpack.c.bf16 %v1464_v58, %v1463_v9  ;;  %v1469_v22 = vmul.f32 %v2298_v19, %v2076_v10 }
 0x422   : > { %v1412_v13 = vpop.f32.mrf.mxu1 }
 0x423   : > { %2088 = vmatprep.mubr.msk.bf16.mxu1 %vm1491_vm6, %v1477_v11  ;;  %v1467_v20 = vmul.f32 %v2292_v14, %v1412_v13  ;;  %v1622_v13 = vld [vmem:[%s2927_s9 + $0x40] sm:$0xff] }
 0x424   : > { %v2077_v63 = vpop.f32.mrf.mxu1  ;;  %2089 = vmatmul.mubr.msk.bf16.gmra.mxu1 %vm1491_vm6, %v1478_v12 }
 0x425   : > { %v1470_v17 = vmul.f32 %v2294_v15, %v2077_v63 }
 0x426   : > { %v1415_v18 = vpop.f32.mrf.mxu1 }
 0x427   : > { %v1468_v21 = vmul.f32 %v2296_v16, %v1415_v18  ;;  %v1480_v25 = vpack.c.bf16 %v1470_v17, %v1469_v22  ;;  %v1625_v16 = vld [vmem:[%s2927_s9 + $0x58] sm:$0xff] }
 0x428   : > { %v2080_v23 = vpop.f32.mrf.mxu1 }
 0x429   : > { %v1479_v24 = vpack.c.bf16 %v1468_v21, %v1467_v20  ;;  %v1473_v36 = vmul.f32 %v2306_v33, %v2080_v23  ;;  %v1623_v20 = vld [vmem:[%s2927_s9 + $0x48] sm:$0xff] }
 0x42a   : > { %v1428_v26 = vpop.f32.mrf.mxu1 }
 0x42b   : > { %2092 = vmatprep.mubr.msk.bf16.mxu1 %vm1491_vm6, %v1479_v24  ;;  %v1471_v34 = vmul.f32 %v2300_v27, %v1428_v26  ;;  %v1628_v24 = vld [vmem:[%s2927_s9 + $0x70] sm:$0xff] }
 0x42c   : > { %v2081_v28 = vpop.f32.mrf.mxu1  ;;  %2093 = vmatmul.mubr.msk.bf16.gmra.mxu1 %vm1491_vm6, %v1480_v25 }
 0x42d   : > { %v1474_v31 = vmul.f32 %v2302_v29, %v2081_v28  ;;  %v1626_v28 = vld [vmem:[%s2927_s9 + $0x60] sm:$0xff] }
 0x42e   : > { %v1431_v32 = vpop.f32.mrf.mxu1 }
 0x42f   : > { %v1472_v35 = vmul.f32 %v2304_v30, %v1431_v32  ;;  %v1482_v38 = vpack.c.bf16 %v1474_v31, %v1473_v36  ;;  %v1629_v32 = vld [vmem:[%s2927_s9 + $0x78] sm:$0xff]  ;;  %v1627_v36 = vld [vmem:[%s2927_s9 + $0x68] sm:$0xff] }
 0x431   : > { %v1481_v37 = vpack.c.bf16 %v1472_v35, %v1471_v34 }
 0x433   : > { %2096 = vmatprep.mubr.msk.bf16.mxu1 %vm1491_vm6, %v1481_v37 }
 0x434   : > { %2097 = vmatmul.mubr.msk.bf16.gmra.mxu1 %vm1491_vm6, %v1482_v38 }
 0x4d8   : > { %v2086_v40 = vpop.f32.mrf.mxu1 }
 0x4d9   : > { %v1634_v42 = vmul.f32 %v2086_v40, %v2929_v39 }
 0x4da   : > { %v1550_v43 = vpop.f32.mrf.mxu1 }
 0x4db   : > { %v1650_v45 = vadd.f32 %v1634_v42, %v1616_v41  ;;  %v1632_v46 = vmul.f32 %v2929_v39, %v1550_v43 }
 0x4dc   : > { %v2087_v47 = vpop.f32.mrf.mxu1 }
 0x4dd   : > { %1667 = vst.msk [vmem:[%s2621_s11 + $0x10] sm:$0xff] %vm1664_vm7, %v1650_v45  ;;  %v1648_v49 = vadd.f32 %v1632_v46, %v1614_v44  ;;  %v1635_v51 = vmul.f32 %v2087_v47, %v2929_v39 }
 0x4de   : > { %v1553_v50 = vpop.f32.mrf.mxu1 }
 0x4df   : > { %1665 = vst.msk [vmem:[%s2621_s11] sm:$0xff] %vm1664_vm7, %v1648_v49  ;;  %v1651_v53 = vadd.f32 %v1635_v51, %v1617_v48  ;;  %v1633_v55 = vmul.f32 %v2929_v39, %v1553_v50 }
 0x4e1   : > { %1668 = vst.msk [vmem:[%s2621_s11 + $0x18] sm:$0xff] %vm1664_vm7, %v1651_v53  ;;  %v1649_v56 = vadd.f32 %v1633_v55, %v1615_v52 }
 0x4e3   : > { %1666 = vst.msk [vmem:[%s2621_s11 + $0x8] sm:$0xff] %vm1664_vm7, %v1649_v56 }
 0x4e4   : > { %v2090_v57 = vpop.f32.mrf.mxu1 }
 0x4e5   : > { %v1638_v61 = vmul.f32 %v2090_v57, %v2929_v39 }
 0x4e6   : > { %v1566_v54 = vpop.f32.mrf.mxu1 }
 0x4e7   : > { %v1654_v62 = vadd.f32 %v1638_v61, %v1620_v59  ;;  %v1636_v0 = vmul.f32 %v2929_v39, %v1566_v54 }
 0x4e8   : > { %v2091_v2 = vpop.f32.mrf.mxu1 }
 0x4e9   : > { %1671 = vst.msk [vmem:[%s2621_s11 + $0x30] sm:$0xff] %vm1664_vm7, %v1654_v62  ;;  %v1652_v4 = vadd.f32 %v1636_v0, %v1618_v60  ;;  %v1639_v5 = vmul.f32 %v2091_v2, %v2929_v39 }
 0x4ea   : > { %v1569_v6 = vpop.f32.mrf.mxu1 }
 0x4eb   : > { %1669 = vst.msk [vmem:[%s2621_s11 + $0x20] sm:$0xff] %vm1664_vm7, %v1652_v4  ;;  %v1655_v8 = vadd.f32 %v1639_v5, %v1621_v3  ;;  %v1637_v9 = vmul.f32 %v2929_v39, %v1569_v6 }
 0x4ec   : > { %v2094_v58 = vpop.f32.mrf.mxu1 }
 0x4ed   : > { %1672 = vst.msk [vmem:[%s2621_s11 + $0x38] sm:$0xff] %vm1664_vm7, %v1655_v8  ;;  %v1653_v10 = vadd.f32 %v1637_v9, %v1619_v7  ;;  %v1642_v11 = vmul.f32 %v2094_v58, %v2929_v39 }
 0x4ee   : > { %v1582_v12 = vpop.f32.mrf.mxu1 }
 0x4ef   : > { %1670 = vst.msk [vmem:[%s2621_s11 + $0x28] sm:$0xff] %vm1664_vm7, %v1653_v10  ;;  %v1658_v14 = vadd.f32 %v1642_v11, %v1624_v1  ;;  %v1640_v63 = vmul.f32 %v2929_v39, %v1582_v12 }
 0x4f0   : > { %v2095_v15 = vpop.f32.mrf.mxu1 }
 0x4f1   : > { %1675 = vst.msk [vmem:[%s2621_s11 + $0x50] sm:$0xff] %vm1664_vm7, %v1658_v14  ;;  %v1656_v17 = vadd.f32 %v1640_v63, %v1622_v13  ;;  %v1643_v18 = vmul.f32 %v2095_v15, %v2929_v39 }
 0x4f2   : > { %v1585_v19 = vpop.f32.mrf.mxu1 }
 0x4f3   : > { %1673 = vst.msk [vmem:[%s2621_s11 + $0x40] sm:$0xff] %vm1664_vm7, %v1656_v17  ;;  %v1659_v21 = vadd.f32 %v1643_v18, %v1625_v16  ;;  %v1641_v22 = vmul.f32 %v2929_v39, %v1585_v19 }
 0x4f4   : > { %v2098_v23 = vpop.f32.mrf.mxu1 }
 0x4f5   : > { %1676 = vst.msk [vmem:[%s2621_s11 + $0x58] sm:$0xff] %vm1664_vm7, %v1659_v21  ;;  %v1657_v25 = vadd.f32 %v1641_v22, %v1623_v20  ;;  %v1646_v26 = vmul.f32 %v2098_v23, %v2929_v39 }
 0x4f6   : > { %v1598_v27 = vpop.f32.mrf.mxu1 }
 0x4f7   : > { %1674 = vst.msk [vmem:[%s2621_s11 + $0x48] sm:$0xff] %vm1664_vm7, %v1657_v25  ;;  %v1662_v29 = vadd.f32 %v1646_v26, %v1628_v24  ;;  %v1644_v30 = vmul.f32 %v2929_v39, %v1598_v27 }
 0x4f8   : > { %v2099_v31 = vpop.f32.mrf.mxu1 }
 0x4f9   : > { %1679 = vst.msk [vmem:[%s2621_s11 + $0x70] sm:$0xff] %vm1664_vm7, %v1662_v29  ;;  %v1660_v33 = vadd.f32 %v1644_v30, %v1626_v28  ;;  %v1647_v34 = vmul.f32 %v2099_v31, %v2929_v39 }
 0x4fa   : > { %v1601_v35 = vpop.f32.mrf.mxu1 }
 0x4fb   : > { %1677 = vst.msk [vmem:[%s2621_s11 + $0x60] sm:$0xff] %vm1664_vm7, %v1660_v33  ;;  %v1663_v37 = vadd.f32 %v1647_v34, %v1629_v32  ;;  %v1645_v38 = vmul.f32 %v2929_v39, %v1601_v35 }
 0x4fd   : > { %1680 = vst.msk [vmem:[%s2621_s11 + $0x78] sm:$0xff] %vm1664_vm7, %v1663_v37  ;;  %v1661_v40 = vadd.f32 %v1645_v38, %v1627_v36 }
 0x4ff   : > { %1678 = vst.msk [vmem:[%s2621_s11 + $0x68] sm:$0xff] %vm1664_vm7, %v1661_v40 }
 0x500   : > { %2348 = shalt.err (!%p2345_p13)
}
 0x501   : > { %s2349_s5 = scalar_lea.hbm %s2997_s25, 2048  ;;  %s2353_s10 = scalar_lea.hbm %s3071_s4, 8192 }
 0x502   : > { %p2350_p0 = scmp.ne.s32.totalorder %s2997_s25, %s2349_s5  ;;  %p2354_p6 = scmp.lt.s32.totalorder %s2997_s25, %s3071_s4 }
 0x503   : > { %p2355_p4 = scmp.lt.s32.totalorder %s2353_s10, %s2349_s5 }
 0x504   : > { %p2351_p3 = pnand %p2350_p0, %p2575_p12 }
 0x505   : > { %p2356_p7 = por %p2355_p4, %p2354_p6 }
 0x506   : > { %p2352_p1 = pneg %p2351_p3 }
 0x508   : > { %p2357_p5 = pnand %p2356_p7, %p2352_p1 }
 0x50a   : > { %2360 = shalt.err (!%p2357_p5)
}
 0x50b   : > { %s2463_s23 = smov 128   ;;  %s2464_s30 = smov 8  }
 0x50c   : > { %2118 = dma.vmem_to_hbm [thread:$0]  (%p2575_p12), %s2999_s24, 2048, %s2997_s25, %s3007_s16, %s2463_s23, %s2463_s23, %s2464_s30  }
 0x50d PF: > { %p2129_p8 = scmp.ge.s32.totalorder %s2455_s26, 2  ;;  %s1712_s6 = sand.u32 1, %s2415_s17  }
 0x50e   : > { %s1713_s27 = scalar_lea.sflag [#allocation10], %s1712_s6 }
 0x50f   : > { %p2125_p9 = pnand %p2129_p8, %p2588_p2 }
 0x511   : > { %p2126_p10 = pneg %p2125_p9 }
 0x513   : > { %2410 = dma.done.wait (%p2126_p10), %s1713_s27, 2048  }
 0x514   : > { %2412 = vsyncadd (%p2126_p10), %s1713_s27, 4294965248  ;;  %s21_s26 = sadd.s32 1, %s2455_s26   ;;  %s3083_s24 = sld [smem:[#allocation14_spill]] }
 0x515   : > { %p18_p11 = scmp.ge.s32.totalorder %s21_s26, 6   ;;  %s3084_s12 = sld [smem:[#allocation15_spill]] }
 0x516   : > { %s3085_s25 = sld [smem:[#allocation16_spill]]  ;;  %s3086_s17 = smov %s2419_s18 }
 0x517   : > { %s3087_s18 = smov %s2423_s19  ;;  %s3088_s19 = smov %s2583_s14 }
 0x518   : > { %s3089_s20 = smov %s2431_s21  ;;  %s3090_s21 = smov %s2435_s22 }
 0x519   : > { %s3091_s22 = smov %s2580_s13  ;;  %s3092_s23 = smov %s2447_s0 }
 0x51a   :  { %20 = sbr.rel (!%p18_p11) target bundleno = 11 (0xb), region = 119 }
 0x51b   : > { %s3093_s0 = smov %s3084_s12 }
 0x51f   :  { %1718 = vsyncpa [#allocation9], 1 }
 0x520   :  { %1720 = vsyncpa [#allocation9 + $0x1], 1 }
 0x521   :  { %1721 = vsyncpa [#allocation10], 1 }
 0x522   :  { %1723 = vsyncpa [#allocation10 + $0x1], 1 }

</bundles_post_ra>
